<compile_context>
chip_gen: v7x
topology: tpu7x:2x2x1
jax: 0.10.0
libtpu: 0.0.40
codegen_flags: <defaults>
</compile_context>

<pallas_src>
import jax
import jax.numpy as jnp
import numpy as np
from jax.experimental import pallas as pl
from jax.experimental.pallas import tpu as pltpu


# -----------------------------------------------------------------------------
# Pallas kernel: whole iAFF forward for one batch element per grid step.
# Param stacks are indexed [0]=local_att, [1]=global_att, [2]=local_att2.
# -----------------------------------------------------------------------------
def iaff_kernel(x_ref, r_ref, w1_ref, b1_ref, w2_ref, b2_ref, o_ref):
    x = x_ref[0]          # (C, HW) float32
    r = r_ref[0]          # (C, HW) float32

    def conv_bn1(v_bf16, idx):
        # (C, n) -> (inter, n): folded Conv1x1 + BN; bf16 MXU matmul, f32 acc.
        return (
            jnp.dot(w1_ref[idx], v_bf16, preferred_element_type=jnp.float32)
            + b1_ref[idx]                       # (inter, 1) bias column
        )

    def conv_bn2(v_f32, idx):
        # (inter, n) -> (C, n)
        return (
            jnp.dot(w2_ref[idx], v_f32.astype(jnp.bfloat16),
                    preferred_element_type=jnp.float32)
            + b2_ref[idx]                       # (C, 1) bias column
        )

    def local_branch(v_f32, idx):
        v16 = v_f32.astype(jnp.bfloat16)
        return conv_bn2(jnp.maximum(conv_bn1(v16, idx), 0.0), idx)

    def global_branch(v_f32, idx):
        # AdaptiveAvgPool2d(1) == mean over the spatial (lane) axis, in f32.
        g = jnp.mean(v_f32, axis=1, keepdims=True)            # (C, 1)
        g16 = g.astype(jnp.bfloat16)
        return conv_bn2(jnp.maximum(conv_bn1(g16, idx), 0.0), idx)  # (C, 1)

    d = x - r                 # hoisted: both blends are  r + d * wei
    xa = x + r

    # Stage 1: wei = sigmoid(local_att(xa) + global_att(xa))
    wei = jax.nn.sigmoid(local_branch(xa, 0) + global_branch(xa, 1))
    xi = r + d * wei          # == x*wei + r*(1-wei)

    # Stage 2: the reference forward reuses self.global_att (idx=1), not
    # global_att2 -- replicate that quirk.
    wei2 = jax.nn.sigmoid(local_branch(xi, 2) + global_branch(xi, 1))
    o_ref[0] = r + d * wei2


# -----------------------------------------------------------------------------
# Wrapper: reshape-only layout + pallas_call.
# -----------------------------------------------------------------------------
def iaff_forward(x_nchw, res_nchw, params):
    B, C, H, W = x_nchw.shape
    HW = H * W

    # NCHW -> (B, C, HW) is a pure reshape (no HBM transpose): C on sublanes,
    # HW on lanes (lane-dense stores for HW a multiple of 128).
    x = x_nchw.reshape(B, C, HW)
    r = res_nchw.reshape(B, C, HW)

    w1, b1, w2, b2 = params   # (3,inter,C) bf16, (3,inter,1) f32, (3,C,inter) bf16, (3,C,1) f32
    inter = w1.shape[1]

    # The PyTorch B==1 duplicate-and-slice path is intentionally skipped: with
    # eval-mode BN folded into the weights both copies are identical.

    out = pl.pallas_call(
        iaff_kernel,
        out_shape=jax.ShapeDtypeStruct((B, C, HW), jnp.float32),
        grid_spec=pltpu.PrefetchScalarGridSpec(
            num_scalar_prefetch=0,
            grid=(B,),
            in_specs=[
                pl.BlockSpec((1, C, HW), lambda b: (b, 0, 0)),
                pl.BlockSpec((1, C, HW), lambda b: (b, 0, 0)),
                # Constant-index weight/bias blocks: fetched once, stay
                # resident across the batch grid.
                pl.BlockSpec((3, inter, C), lambda b: (0, 0, 0)),
                pl.BlockSpec((3, inter, 1), lambda b: (0, 0, 0)),
                pl.BlockSpec((3, C, inter), lambda b: (0, 0, 0)),
                pl.BlockSpec((3, C, 1), lambda b: (0, 0, 0)),
            ],
            out_specs=pl.BlockSpec((1, C, HW), lambda b: (b, 0, 0)),
        ),
        compiler_params=pltpu.CompilerParams(
            dimension_semantics=("parallel",),   # batch axis -> both TCs on v7x
        ),
    )(x, r, w1, b1, w2, b2)

    return out.reshape(B, C, H, W)


# -----------------------------------------------------------------------------
# Deterministic parameter construction (eval-mode BN folded into conv).
# Each branch = Conv(C->inter) + BN(inter) + ReLU + Conv(inter->C) + BN(C).
# Weights are kept in PyTorch (Cout, Cin) orientation for left-multiplication
# and cast to bf16; biases are stored as f32 columns (Cout, 1).
# -----------------------------------------------------------------------------
def make_params(key, channels=64, r=4):
    inter = channels // r
    eps = 1e-5

    def fold(conv_w, conv_b, gamma, beta, mean, var):
        # y = gamma * (W x + b - mean) / sqrt(var + eps) + beta
        scale = gamma / jnp.sqrt(var + eps)                  # (Cout,)
        w_fold = conv_w * scale[:, None]                     # (Cout, Cin)
        b_fold = scale * (conv_b - mean) + beta              # (Cout,)
        return w_fold, b_fold

    def branch_params(k):
        ks = jax.random.split(k, 10)
        w1 = jax.random.normal(ks[0], (inter, channels), jnp.float32) * 0.1
        b1 = jax.random.normal(ks[1], (inter,), jnp.float32) * 0.1
        g1 = 1.0 + 0.1 * jax.random.normal(ks[2], (inter,), jnp.float32)
        be1 = 0.1 * jax.random.normal(ks[3], (inter,), jnp.float32)
        m1 = 0.1 * jax.random.normal(ks[4], (inter,), jnp.float32)
        v1 = jnp.abs(jax.random.normal(ks[5], (inter,), jnp.float32)) + 0.5

        w2 = jax.random.normal(ks[6], (channels, inter), jnp.float32) * 0.1
        b2 = jax.random.normal(ks[7], (channels,), jnp.float32) * 0.1
        g2 = 1.0 + 0.1 * jax.random.normal(ks[8], (channels,), jnp.float32)
        be2 = 0.1 * jax.random.normal(ks[9], (channels,), jnp.float32)
        m2 = jnp.zeros((channels,), jnp.float32)
        v2 = jnp.ones((channels,), jnp.float32)

        w1f, b1f = fold(w1, b1, g1, be1, m1, v1)
        w2f, b2f = fold(w2, b2, g2, be2, m2, v2)
        return w1f, b1f, w2f, b2f

    kl, kg, kl2 = jax.random.split(key, 3)
    blocks = [branch_params(kl), branch_params(kg), branch_params(kl2)]
    # global_att2 parameters exist in the PyTorch module but the reference
    # forward never uses them (it calls global_att twice), so none are built.

    w1 = jnp.stack([b[0] for b in blocks]).astype(jnp.bfloat16)   # (3, inter, C)
    b1 = jnp.stack([b[1] for b in blocks])[..., None]             # (3, inter, 1) f32
    w2 = jnp.stack([b[2] for b in blocks]).astype(jnp.bfloat16)   # (3, C, inter)
    b2 = jnp.stack([b[3] for b in blocks])[..., None]             # (3, C, 1) f32
    return w1, b1, w2, b2


# -----------------------------------------------------------------------------
# Pure-JAX reference with the identical precision recipe (bf16 matmul operands,
# f32 accumulation, f32 element-wise), for a tight correctness check.
# -----------------------------------------------------------------------------
def ref_forward(x_nchw, res_nchw, params):
    B, C, H, W = x_nchw.shape
    HW = H * W
    w1, b1, w2, b2 = params
    x = x_nchw.reshape(B, C, HW)
    r = res_nchw.reshape(B, C, HW)

    def conv_bn1(v, i):
        return jnp.einsum("oc,bcn->bon", w1[i], v.astype(jnp.bfloat16),
                          preferred_element_type=jnp.float32) + b1[i][None]

    def conv_bn2(v, i):
        return jnp.einsum("oc,bcn->bon", w2[i], v.astype(jnp.bfloat16),
                          preferred_element_type=jnp.float32) + b2[i][None]

    def local_b(v, i):
        return conv_bn2(jnp.maximum(conv_bn1(v, i), 0.0), i)

    def global_b(v, i):
        g = jnp.mean(v, axis=2, keepdims=True)
        return conv_bn2(jnp.maximum(conv_bn1(g, i), 0.0), i)

    d = x - r
    xa = x + r
    wei = jax.nn.sigmoid(local_b(xa, 0) + global_b(xa, 1))
    xi = r + d * wei
    wei2 = jax.nn.sigmoid(local_b(xi, 2) + global_b(xi, 1))
    xo = r + d * wei2
    return xo.reshape(B, C, H, W)


if __name__ == "__main__":
    channels, r_ratio = 64, 4
    B, H, W = 2, 16, 16            # HW = 256 -> lane-dense stores

    key = jax.random.PRNGKey(0)
    kp, kx, kr = jax.random.split(key, 3)
    params = make_params(kp, channels=channels, r=r_ratio)

    x = jax.random.normal(kx, (B, channels, H, W), jnp.float32)
    residual = jax.random.normal(kr, (B, channels, H, W), jnp.float32)

    out = jax.block_until_ready(iaff_forward(x, residual, params))
    ref = jax.block_until_ready(ref_forward(x, residual, params))

    np.testing.assert_allclose(np.asarray(out), np.asarray(ref),
                               rtol=1e-3, atol=1e-3)
    assert out.shape == (B, channels, H, W)
    print("KERNEL_OK")
</pallas_src>

<mosaic_0001>
module attributes {stable_mosaic.version = 11 : i64} {
  func.func @iaff_kernel(%arg0: i32, %arg1: memref<1x64x256xf32, #tpu.memory_space<vmem>>, %arg2: memref<1x64x256xf32, #tpu.memory_space<vmem>>, %arg3: memref<3x16x64xbf16, #tpu.memory_space<vmem>>, %arg4: memref<3x16x1xf32, #tpu.memory_space<vmem>>, %arg5: memref<3x64x16xbf16, #tpu.memory_space<vmem>>, %arg6: memref<3x64x1xf32, #tpu.memory_space<vmem>>, %arg7: memref<1x64x256xf32, #tpu.memory_space<vmem>>) attributes {dimension_semantics = [#tpu.dimension_semantics<parallel>], iteration_bounds = array<i64: 2>, scalar_prefetch = 0 : i64, scratch_operands = 0 : i64, tpu.core_type = #tpu.core_type<tc>, window_params = [{transform_indices = @transform_0, window_bounds = array<i64: 1, 64, 256>}, {transform_indices = @transform_1, window_bounds = array<i64: 1, 64, 256>}, {pipeline_mode = #tpu.pipeline_mode<synchronous>, transform_indices = @transform_2, window_bounds = array<i64: 3, 16, 64>}, {pipeline_mode = #tpu.pipeline_mode<synchronous>, transform_indices = @transform_3, window_bounds = array<i64: 3, 16, 1>}, {pipeline_mode = #tpu.pipeline_mode<synchronous>, transform_indices = @transform_4, window_bounds = array<i64: 3, 64, 16>}, {pipeline_mode = #tpu.pipeline_mode<synchronous>, transform_indices = @transform_5, window_bounds = array<i64: 3, 64, 1>}, {transform_indices = @transform_6, window_bounds = array<i64: 1, 64, 256>}]} {
    %c0 = arith.constant 0 : index
    %c0_0 = arith.constant 0 : index
    %c0_1 = arith.constant 0 : index
    %0 = vector.load %arg1[%c0, %c0_0, %c0_1] : memref<1x64x256xf32, #tpu.memory_space<vmem>>, vector<1x64x256xf32>
    %1 = vector.shape_cast %0 : vector<1x64x256xf32> to vector<64x256xf32>
    %c0_2 = arith.constant 0 : index
    %c0_3 = arith.constant 0 : index
    %c0_4 = arith.constant 0 : index
    %2 = vector.load %arg2[%c0_2, %c0_3, %c0_4] : memref<1x64x256xf32, #tpu.memory_space<vmem>>, vector<1x64x256xf32>
    %3 = vector.shape_cast %2 : vector<1x64x256xf32> to vector<64x256xf32>
    %4 = arith.subf %1, %3 : vector<64x256xf32>
    %5 = arith.addf %1, %3 : vector<64x256xf32>
    %6 = arith.truncf %5 : vector<64x256xf32> to vector<64x256xbf16>
    %c0_5 = arith.constant 0 : index
    %c0_6 = arith.constant 0 : index
    %c0_7 = arith.constant 0 : index
    %7 = vector.load %arg3[%c0_5, %c0_6, %c0_7] : memref<3x16x64xbf16, #tpu.memory_space<vmem>>, vector<1x16x64xbf16>
    %8 = vector.shape_cast %7 : vector<1x16x64xbf16> to vector<16x64xbf16>
    %cst = arith.constant dense<0.000000e+00> : vector<16x256xf32>
    %9 = tpu.matmul %8, %6, %cst {dimension_numbers = #tpu.dot_dimension_numbers<[1], [0], [0], [1], [0, 0, 1, 1], [], []>} : vector<16x64xbf16>, vector<64x256xbf16>, vector<16x256xf32> -> vector<16x256xf32>
    %c0_8 = arith.constant 0 : index
    %c0_9 = arith.constant 0 : index
    %c0_10 = arith.constant 0 : index
    %10 = vector.load %arg4[%c0_8, %c0_9, %c0_10] : memref<3x16x1xf32, #tpu.memory_space<vmem>>, vector<1x16x1xf32>
    %11 = vector.shape_cast %10 : vector<1x16x1xf32> to vector<16x1xf32>
    %12 = vector.broadcast %11 : vector<16x1xf32> to vector<16x256xf32>
    %13 = arith.addf %9, %12 : vector<16x256xf32>
    %cst_11 = arith.constant 0.000000e+00 : f32
    %14 = vector.broadcast %cst_11 : f32 to vector<16x256xf32>
    %15 = arith.maximumf %13, %14 : vector<16x256xf32>
    %c0_12 = arith.constant 0 : index
    %c0_13 = arith.constant 0 : index
    %c0_14 = arith.constant 0 : index
    %16 = vector.load %arg5[%c0_12, %c0_13, %c0_14] : memref<3x64x16xbf16, #tpu.memory_space<vmem>>, vector<1x64x16xbf16>
    %17 = vector.shape_cast %16 : vector<1x64x16xbf16> to vector<64x16xbf16>
    %18 = arith.truncf %15 : vector<16x256xf32> to vector<16x256xbf16>
    %cst_15 = arith.constant dense<0.000000e+00> : vector<64x256xf32>
    %19 = tpu.matmul %17, %18, %cst_15 {dimension_numbers = #tpu.dot_dimension_numbers<[1], [0], [0], [1], [0, 0, 1, 1], [], []>} : vector<64x16xbf16>, vector<16x256xbf16>, vector<64x256xf32> -> vector<64x256xf32>
    %c0_16 = arith.constant 0 : index
    %c0_17 = arith.constant 0 : index
    %c0_18 = arith.constant 0 : index
    %20 = vector.load %arg6[%c0_16, %c0_17, %c0_18] : memref<3x64x1xf32, #tpu.memory_space<vmem>>, vector<1x64x1xf32>
    %21 = vector.shape_cast %20 : vector<1x64x1xf32> to vector<64x1xf32>
    %22 = vector.broadcast %21 : vector<64x1xf32> to vector<64x256xf32>
    %23 = arith.addf %19, %22 : vector<64x256xf32>
    %cst_19 = arith.constant dense<0.000000e+00> : vector<64xf32>
    %24 = vector.multi_reduction <add>, %5, %cst_19 [1] : vector<64x256xf32> to vector<64xf32>
    %25 = vector.shape_cast %24 : vector<64xf32> to vector<64x1xf32>
    %cst_20 = arith.constant 2.560000e+02 : f32
    %26 = vector.broadcast %cst_20 : f32 to vector<64x1xf32>
    %27 = arith.divf %25, %26 : vector<64x1xf32>
    %28 = arith.truncf %27 : vector<64x1xf32> to vector<64x1xbf16>
    %c1 = arith.constant 1 : index
    %c0_21 = arith.constant 0 : index
    %c0_22 = arith.constant 0 : index
    %29 = vector.load %arg3[%c1, %c0_21, %c0_22] : memref<3x16x64xbf16, #tpu.memory_space<vmem>>, vector<1x16x64xbf16>
    %30 = vector.shape_cast %29 : vector<1x16x64xbf16> to vector<16x64xbf16>
    %cst_23 = arith.constant dense<0.000000e+00> : vector<16x1xf32>
    %31 = tpu.matmul %30, %28, %cst_23 {dimension_numbers = #tpu.dot_dimension_numbers<[1], [0], [0], [1], [0, 0, 1, 1], [], []>} : vector<16x64xbf16>, vector<64x1xbf16>, vector<16x1xf32> -> vector<16x1xf32>
    %c1_24 = arith.constant 1 : index
    %c0_25 = arith.constant 0 : index
    %c0_26 = arith.constant 0 : index
    %32 = vector.load %arg4[%c1_24, %c0_25, %c0_26] : memref<3x16x1xf32, #tpu.memory_space<vmem>>, vector<1x16x1xf32>
    %33 = vector.shape_cast %32 : vector<1x16x1xf32> to vector<16x1xf32>
    %34 = arith.addf %31, %33 : vector<16x1xf32>
    %cst_27 = arith.constant 0.000000e+00 : f32
    %35 = vector.broadcast %cst_27 : f32 to vector<16x1xf32>
    %36 = arith.maximumf %34, %35 : vector<16x1xf32>
    %c1_28 = arith.constant 1 : index
    %c0_29 = arith.constant 0 : index
    %c0_30 = arith.constant 0 : index
    %37 = vector.load %arg5[%c1_28, %c0_29, %c0_30] : memref<3x64x16xbf16, #tpu.memory_space<vmem>>, vector<1x64x16xbf16>
    %38 = vector.shape_cast %37 : vector<1x64x16xbf16> to vector<64x16xbf16>
    %39 = arith.truncf %36 : vector<16x1xf32> to vector<16x1xbf16>
    %cst_31 = arith.constant dense<0.000000e+00> : vector<64x1xf32>
    %40 = tpu.matmul %38, %39, %cst_31 {dimension_numbers = #tpu.dot_dimension_numbers<[1], [0], [0], [1], [0, 0, 1, 1], [], []>} : vector<64x16xbf16>, vector<16x1xbf16>, vector<64x1xf32> -> vector<64x1xf32>
    %c1_32 = arith.constant 1 : index
    %c0_33 = arith.constant 0 : index
    %c0_34 = arith.constant 0 : index
    %41 = vector.load %arg6[%c1_32, %c0_33, %c0_34] : memref<3x64x1xf32, #tpu.memory_space<vmem>>, vector<1x64x1xf32>
    %42 = vector.shape_cast %41 : vector<1x64x1xf32> to vector<64x1xf32>
    %43 = arith.addf %40, %42 : vector<64x1xf32>
    %44 = vector.broadcast %43 : vector<64x1xf32> to vector<64x256xf32>
    %45 = arith.addf %23, %44 : vector<64x256xf32>
    %46 = arith.negf %45 : vector<64x256xf32>
    %47 = math.exp %46 : vector<64x256xf32>
    %cst_35 = arith.constant 1.000000e+00 : f32
    %48 = vector.broadcast %cst_35 : f32 to vector<64x256xf32>
    %49 = arith.addf %48, %47 : vector<64x256xf32>
    %50 = arith.divf %48, %49 : vector<64x256xf32>
    %51 = arith.mulf %4, %50 : vector<64x256xf32>
    %52 = arith.addf %3, %51 : vector<64x256xf32>
    %53 = arith.truncf %52 : vector<64x256xf32> to vector<64x256xbf16>
    %c2 = arith.constant 2 : index
    %c0_36 = arith.constant 0 : index
    %c0_37 = arith.constant 0 : index
    %54 = vector.load %arg3[%c2, %c0_36, %c0_37] : memref<3x16x64xbf16, #tpu.memory_space<vmem>>, vector<1x16x64xbf16>
    %55 = vector.shape_cast %54 : vector<1x16x64xbf16> to vector<16x64xbf16>
    %cst_38 = arith.constant dense<0.000000e+00> : vector<16x256xf32>
    %56 = tpu.matmul %55, %53, %cst_38 {dimension_numbers = #tpu.dot_dimension_numbers<[1], [0], [0], [1], [0, 0, 1, 1], [], []>} : vector<16x64xbf16>, vector<64x256xbf16>, vector<16x256xf32> -> vector<16x256xf32>
    %c2_39 = arith.constant 2 : index
    %c0_40 = arith.constant 0 : index
    %c0_41 = arith.constant 0 : index
    %57 = vector.load %arg4[%c2_39, %c0_40, %c0_41] : memref<3x16x1xf32, #tpu.memory_space<vmem>>, vector<1x16x1xf32>
    %58 = vector.shape_cast %57 : vector<1x16x1xf32> to vector<16x1xf32>
    %59 = vector.broadcast %58 : vector<16x1xf32> to vector<16x256xf32>
    %60 = arith.addf %56, %59 : vector<16x256xf32>
    %cst_42 = arith.constant 0.000000e+00 : f32
    %61 = vector.broadcast %cst_42 : f32 to vector<16x256xf32>
    %62 = arith.maximumf %60, %61 : vector<16x256xf32>
    %c2_43 = arith.constant 2 : index
    %c0_44 = arith.constant 0 : index
    %c0_45 = arith.constant 0 : index
    %63 = vector.load %arg5[%c2_43, %c0_44, %c0_45] : memref<3x64x16xbf16, #tpu.memory_space<vmem>>, vector<1x64x16xbf16>
    %64 = vector.shape_cast %63 : vector<1x64x16xbf16> to vector<64x16xbf16>
    %65 = arith.truncf %62 : vector<16x256xf32> to vector<16x256xbf16>
    %cst_46 = arith.constant dense<0.000000e+00> : vector<64x256xf32>
    %66 = tpu.matmul %64, %65, %cst_46 {dimension_numbers = #tpu.dot_dimension_numbers<[1], [0], [0], [1], [0, 0, 1, 1], [], []>} : vector<64x16xbf16>, vector<16x256xbf16>, vector<64x256xf32> -> vector<64x256xf32>
    %c2_47 = arith.constant 2 : index
    %c0_48 = arith.constant 0 : index
    %c0_49 = arith.constant 0 : index
    %67 = vector.load %arg6[%c2_47, %c0_48, %c0_49] : memref<3x64x1xf32, #tpu.memory_space<vmem>>, vector<1x64x1xf32>
    %68 = vector.shape_cast %67 : vector<1x64x1xf32> to vector<64x1xf32>
    %69 = vector.broadcast %68 : vector<64x1xf32> to vector<64x256xf32>
    %70 = arith.addf %66, %69 : vector<64x256xf32>
    %cst_50 = arith.constant dense<0.000000e+00> : vector<64xf32>
    %71 = vector.multi_reduction <add>, %52, %cst_50 [1] : vector<64x256xf32> to vector<64xf32>
    %72 = vector.shape_cast %71 : vector<64xf32> to vector<64x1xf32>
    %cst_51 = arith.constant 2.560000e+02 : f32
    %73 = vector.broadcast %cst_51 : f32 to vector<64x1xf32>
    %74 = arith.divf %72, %73 : vector<64x1xf32>
    %75 = arith.truncf %74 : vector<64x1xf32> to vector<64x1xbf16>
    %c1_52 = arith.constant 1 : index
    %c0_53 = arith.constant 0 : index
    %c0_54 = arith.constant 0 : index
    %76 = vector.load %arg3[%c1_52, %c0_53, %c0_54] : memref<3x16x64xbf16, #tpu.memory_space<vmem>>, vector<1x16x64xbf16>
    %77 = vector.shape_cast %76 : vector<1x16x64xbf16> to vector<16x64xbf16>
    %cst_55 = arith.constant dense<0.000000e+00> : vector<16x1xf32>
    %78 = tpu.matmul %77, %75, %cst_55 {dimension_numbers = #tpu.dot_dimension_numbers<[1], [0], [0], [1], [0, 0, 1, 1], [], []>} : vector<16x64xbf16>, vector<64x1xbf16>, vector<16x1xf32> -> vector<16x1xf32>
    %c1_56 = arith.constant 1 : index
    %c0_57 = arith.constant 0 : index
    %c0_58 = arith.constant 0 : index
    %79 = vector.load %arg4[%c1_56, %c0_57, %c0_58] : memref<3x16x1xf32, #tpu.memory_space<vmem>>, vector<1x16x1xf32>
    %80 = vector.shape_cast %79 : vector<1x16x1xf32> to vector<16x1xf32>
    %81 = arith.addf %78, %80 : vector<16x1xf32>
    %cst_59 = arith.constant 0.000000e+00 : f32
    %82 = vector.broadcast %cst_59 : f32 to vector<16x1xf32>
    %83 = arith.maximumf %81, %82 : vector<16x1xf32>
    %c1_60 = arith.constant 1 : index
    %c0_61 = arith.constant 0 : index
    %c0_62 = arith.constant 0 : index
    %84 = vector.load %arg5[%c1_60, %c0_61, %c0_62] : memref<3x64x16xbf16, #tpu.memory_space<vmem>>, vector<1x64x16xbf16>
    %85 = vector.shape_cast %84 : vector<1x64x16xbf16> to vector<64x16xbf16>
    %86 = arith.truncf %83 : vector<16x1xf32> to vector<16x1xbf16>
    %cst_63 = arith.constant dense<0.000000e+00> : vector<64x1xf32>
    %87 = tpu.matmul %85, %86, %cst_63 {dimension_numbers = #tpu.dot_dimension_numbers<[1], [0], [0], [1], [0, 0, 1, 1], [], []>} : vector<64x16xbf16>, vector<16x1xbf16>, vector<64x1xf32> -> vector<64x1xf32>
    %c1_64 = arith.constant 1 : index
    %c0_65 = arith.constant 0 : index
    %c0_66 = arith.constant 0 : index
    %88 = vector.load %arg6[%c1_64, %c0_65, %c0_66] : memref<3x64x1xf32, #tpu.memory_space<vmem>>, vector<1x64x1xf32>
    %89 = vector.shape_cast %88 : vector<1x64x1xf32> to vector<64x1xf32>
    %90 = arith.addf %87, %89 : vector<64x1xf32>
    %91 = vector.broadcast %90 : vector<64x1xf32> to vector<64x256xf32>
    %92 = arith.addf %70, %91 : vector<64x256xf32>
    %93 = arith.negf %92 : vector<64x256xf32>
    %94 = math.exp %93 : vector<64x256xf32>
    %cst_67 = arith.constant 1.000000e+00 : f32
    %95 = vector.broadcast %cst_67 : f32 to vector<64x256xf32>
    %96 = arith.addf %95, %94 : vector<64x256xf32>
    %97 = arith.divf %95, %96 : vector<64x256xf32>
    %98 = arith.mulf %4, %97 : vector<64x256xf32>
    %99 = arith.addf %3, %98 : vector<64x256xf32>
    %c0_68 = arith.constant 0 : index
    %c0_69 = arith.constant 0 : index
    %c0_70 = arith.constant 0 : index
    %100 = vector.load %arg7[%c0_68, %c0_69, %c0_70] : memref<1x64x256xf32, #tpu.memory_space<vmem>>, vector<1x64x256xf32>
    %101 = vector.shape_cast %100 : vector<1x64x256xf32> to vector<64x256xf32>
    %102 = vector.shape_cast %99 : vector<64x256xf32> to vector<1x64x256xf32>
    tpu.vector_store %arg7[%c0_68, %c0_69, %c0_70], %102 {strides = array<i32>} : memref<1x64x256xf32, #tpu.memory_space<vmem>>, vector<1x64x256xf32>,
    return
  }
  func.func @transform_0(%arg0: i32) -> (i32, i32, i32) {
    %c0_i32 = arith.constant 0 : i32
    %c0_i32_0 = arith.constant 0 : i32
    %c0_i32_1 = arith.constant 0 : i32
    return %arg0, %c0_i32, %c0_i32_0 : i32, i32, i32
  }
  func.func @transform_1(%arg0: i32) -> (i32, i32, i32) {
    %c0_i32 = arith.constant 0 : i32
    %c0_i32_0 = arith.constant 0 : i32
    %c0_i32_1 = arith.constant 0 : i32
    return %arg0, %c0_i32, %c0_i32_0 : i32, i32, i32
  }
  func.func @transform_2(%arg0: i32) -> (i32, i32, i32) {
    %c0_i32 = arith.constant 0 : i32
    %c0_i32_0 = arith.constant 0 : i32
    %c0_i32_1 = arith.constant 0 : i32
    %c0_i32_2 = arith.constant 0 : i32
    return %c0_i32, %c0_i32_0, %c0_i32_1 : i32, i32, i32
  }
  func.func @transform_3(%arg0: i32) -> (i32, i32, i32) {
    %c0_i32 = arith.constant 0 : i32
    %c0_i32_0 = arith.constant 0 : i32
    %c0_i32_1 = arith.constant 0 : i32
    %c0_i32_2 = arith.constant 0 : i32
    return %c0_i32, %c0_i32_0, %c0_i32_1 : i32, i32, i32
  }
  func.func @transform_4(%arg0: i32) -> (i32, i32, i32) {
    %c0_i32 = arith.constant 0 : i32
    %c0_i32_0 = arith.constant 0 : i32
    %c0_i32_1 = arith.constant 0 : i32
    %c0_i32_2 = arith.constant 0 : i32
    return %c0_i32, %c0_i32_0, %c0_i32_1 : i32, i32, i32
  }
  func.func @transform_5(%arg0: i32) -> (i32, i32, i32) {
    %c0_i32 = arith.constant 0 : i32
    %c0_i32_0 = arith.constant 0 : i32
    %c0_i32_1 = arith.constant 0 : i32
    %c0_i32_2 = arith.constant 0 : i32
    return %c0_i32, %c0_i32_0, %c0_i32_1 : i32, i32, i32
  }
  func.func @transform_6(%arg0: i32) -> (i32, i32, i32) {
    %c0_i32 = arith.constant 0 : i32
    %c0_i32_0 = arith.constant 0 : i32
    %c0_i32_1 = arith.constant 0 : i32
    return %arg0, %c0_i32, %c0_i32_0 : i32, i32, i32
  }
}

</mosaic_0001>

<bundles_post_ra>
// kernel: tpu_custom_call.1
= control target key start
LH: loop header
LB: loop body
LE: loop exit
PB: predicated region body
PF: predicated region fallthrough
CT: control target
= control target key end

     0   :  { %11 = vsyncpa [#allocation3], 0  ;;  %s2990_s0 = inlined_call_operand.vmem [shape: f32[2,64,256], index: 0, kind: input, shape index: {}]   ;;  %s2991_s1 = inlined_call_operand.hbm [shape: f32[2,64,256], index: 1, kind: input, shape index: {}]   ;;  %s2992_s2 = inlined_call_operand.vmem [shape: bf16[3,16,64], index: 2, kind: input, shape index: {}]   ;;  %s2993_s3 = inlined_call_operand.vmem [shape: f32[3,16,1], index: 3, kind: input, shape index: {}]   ;;  %s2994_s4 = inlined_call_operand.vmem [shape: bf16[3,64,16], index: 4, kind: input, shape index: {}]   ;;  %s2995_s5 = inlined_call_operand.vmem [shape: f32[3,64,1], index: 5, kind: input, shape index: {}]   ;;  %s2996_s6 = inlined_call_operand.hbm [shape: f32[2,64,256], index: 6, kind: output, shape index: {}]  }
   0x1   :  { %13 = vsyncpa [#allocation3 + $0x1], 0 }
   0x2   :  { %14 = vsyncpa [#allocation4], 0 }
   0x3   :  { %16 = vsyncpa [#allocation4 + $0x1], 0  ;;  %s2225_s21 = smov 0   ;;  %s2227_s22 = smov 0  }
   0x4   :  { %s2229_s23 = smov 0   ;;  %s2231_s24 = smov 0  }
   0x5 LB: > { %s2246_s25 = sadd.s32 4294967295, %s2179_s24   ;;  %s1679_s26 = sadd.s32 4294967294, %s2179_s24   ;;  %s2179_s24 = sphi %s2231_s24, %s3084_s24   ;;  %s2175_s23 = sphi %s2229_s23, %s3083_s23   ;;  %s2171_s22 = sphi %s2227_s22, %s3082_s22   ;;  %s2167_s21 = sphi %s2225_s21, %s3081_s21  }
   0x6   : > { %s2250_s27 = sadd.s32 1, %s2179_s24   ;;  %s55_s28 = sadd.s32 1, %s2175_s23 }
   0x7   : > { %s52_s29 = ssub.s32 %s2179_s24, %s2250_s27  ;;  %p62_p0 = scmp.ne.s32.totalorder %s2175_s23, %s2171_s22 }
   0x8   : > { %p53_p1 = scmp.eq.s32.totalorder %s52_s29, 0  ;;  %p63_p2 = scmp.eq.s32.totalorder %s2179_s24, 0 }
   0x9   : > { %p68_p3 = scmp.ne.s32.totalorder %s2171_s22, %s2167_s21  ;;  %p69_p4 = scmp.eq.s32.totalorder %s2246_s25, 0 }
   0xa   : > { %s2262_s30 = scalar_select %p53_p1, %s2175_s23, %s55_s28  }
   0xb   : > { %p2264_p5 = por %p63_p2, %p62_p0  ;;  %p2268_p6 = por %p69_p4, %p68_p3 }
   0xc   : > { %p176_p7 = scmp.eq.s32.totalorder %s2246_s25, 1  ;;  %p182_p8 = scmp.eq.s32.totalorder %s1679_s26, 1 }
   0xd   : > { %p1881_p10 = scmp.lt.s32.totalorder %s2179_s24, 2  ;;  %s222_s11 = sand.u32 1, %s2175_s23  }
   0xe   : > { %p2275_p11 = por %p176_p7, %p62_p0  ;;  %p2279_p12 = por %p182_p8, %p68_p3 }
   0xf   : > { %s1802_s12 = sshll.u32 %s2179_s24, 11  ;;  %s1682_s13 = sshll.u32 %s222_s11, 7 }
  0x10   : > { %s3029_s9 = scalar_select %p2275_p11, 1, 0 }
  0x11   : > { %s3030_s10 = scalar_select %p2279_p12, 1, 0 }
  0x12   : > { %s2288_s16 = scalar_lea.hbm %s2991_s1, %s1802_s12  ;;  %s226_s17 = scalar_lea.vmem [#allocation2], %s1682_s13 }
  0x13   : > { %s233_s18 = sshll.u32 %s226_s17, 4  ;;  %p2292_p13 = pnand %p1881_p10, %p2264_p5  ;;  %s2296_s18 = int_to_ptr.vmem [resolvable:$true] %s233_s18 }
  0x14   : > { %s2298_s20 = scalar_lea.sflag [#allocation3], %s222_s11  ;;  %s2083_s26 = scalar_lea.hbm %s2288_s16, 2048 }
  0x15   : > { %p2084_p0 = scmp.ne.s32.totalorder %s2288_s16, %s2083_s26  ;;  %p2085_p1 = pneg %p2292_p13 }
  0x16   : > { %s2088_s7 = scalar_lea.hbm %s2991_s1, 4096  ;;  %p2089_p4 = scmp.lt.u32.totalorder %s2288_s16, %s2991_s1 }
  0x17   : > { %p2086_p2 = pnand %p2085_p1, %p2084_p0  ;;  %p2090_p5 = scmp.lt.u32.totalorder %s2088_s7, %s2083_s26 }
  0x18   : > { %p2092_p8 = scmp.lt.u32.totalorder %s2083_s26, %s2288_s16 }
  0x19   : > { %p2087_p3 = pneg %p2086_p2  ;;  %p2091_p7 = por %p2090_p5, %p2089_p4 }
  0x1b   : > { %p2093_p10 = por %p2092_p8, %p2091_p7 }
  0x1d   : > { %p2094_p9 = pnand %p2093_p10, %p2087_p3 }
  0x1f   : > { %2097 = shalt.err (!%p2094_p9)
}
  0x20   : > { %s2098_s11 = scalar_lea.vmem %s2296_s18, 2048  ;;  %s2181_s14 = smov [#allocation2]  }
  0x21   : > { %p2099_p0 = scmp.ne.s32.totalorder %s2296_s18, %s2098_s11  ;;  %s2103_s15 = sshll.u32 %s2181_s14, 4  ;;  %s2104_s15 = int_to_ptr.vmem [resolvable:$false] %s2103_s15 }
  0x22   : > { %s2105_s17 = scalar_lea.vmem %s2104_s15, 4096  ;;  %p2106_p11 = scmp.lt.s32.totalorder %s2296_s18, %s2104_s15 }
  0x23   : > { %p2101_p2 = pnand %p2099_p0, %p2085_p1  ;;  %p2107_p4 = scmp.lt.s32.totalorder %s2105_s17, %s2098_s11 }
  0x25   : > { %p2102_p12 = pneg %p2101_p2  ;;  %p2108_p5 = por %p2107_p4, %p2106_p11 }
  0x27   : > { %p2109_p7 = pnand %p2108_p5, %p2102_p12 }
  0x29   : > { %2112 = shalt.err (!%p2109_p7)
}
  0x2a   : > { %s2182_s26 = smov 256   ;;  %s2183_s28 = smov 16  }
  0x2b   : > { %1876 = dma.hbm_to_vmem [thread:$0]  (!%p2292_p13), %s2288_s16, 2048, %s2296_s18, %s2298_s20, %s2182_s26, %s2182_s26, %s2183_s28  }
  0x2c   : > { %p1685_p9 = scmp.ge.s32.totalorder %s2179_s24, 1  ;;  %p241_p1 = scmp.lt.s32.totalorder %s2179_s24, 3 }
  0x2e   : > { %p242_p3 = pnand %p1685_p9, %p241_p1 }
  0x30   : > { %245 = sbr.rel (%p242_p3) target bundleno = 1656 (0x678), region = 44 }
  0x37   : > { %s2329_s29 = sand.u32 1, %s2171_s22  }
  0x38   : > { %s1686_s7 = sshll.u32 %s2329_s29, 7  ;;  %s248_s12 = scalar_lea.sflag [#allocation3], %s2329_s29 }
  0x39   : > { %s2335_s13 = scalar_lea.vmem [#allocation2], %s1686_s7 }
  0x3a   : > { %2158 = dma.done.wait (%p2268_p6), %s248_s12, 2048  }
  0x3b   : > { %2160 = vsyncadd (%p2268_p6), %s248_s12, 4294965248  ;;  %p285_p11 = scmp.lt.s32.totalorder %s2246_s25, 1  ;;  %v2998_v0 = vmov 0   ;;  %v2359_v3 = vld [vmem:[%s2335_s13 + $0x20] sm:$0xff]  ;;  %v2362_v4 = vld [vmem:[%s2335_s13 + $0x28] sm:$0xff]  ;;  %vm382_vm0 = vcmask 523264  }
  0x3c   : > { %418 = vmatprep.mubr.bf16.mxu0 %v2998_v0  ;;  %1923 = vset.pattern.permute.xlu1 %v2998_v0  ;;  %v2375_v9 = vld [vmem:[%s2335_s13 + $0x8] sm:$0xff]  ;;  %v2378_v10 = vld [vmem:[%s2335_s13 + $0x18] sm:$0xff]  ;;  %v2388_v14 = vld [vmem:[%s2335_s13] sm:$0xff]  ;;  %vm2186_vm1 = vmmov 0   ;;  %vm511_vm2 = vcmask 130048   ;;  %s2895_s12 = scalar_lea.vmem [#allocation5], %s1686_s7 }
  0x3d   : > { %s286_s16 = scalar_select %p285_p11, %s2246_s25, 1  ;;  %1922 = vset.pattern.permute.xlu0 %v2998_v0  ;;  %556 = vmatprep.mubr.bf16.mxu1 %v2998_v0  ;;  %v2394_v16 = vld [vmem:[%s2335_s13 + $0x10] sm:$0xff]  ;;  %v2410_v24 = vld [vmem:[%s2335_s13 + $0x38] sm:$0xff]  ;;  %v2423_v30 = vld [vmem:[%s2335_s13 + $0x48] sm:$0xff] }
  0x3e   : > { %v2405_v21 = vld [vmem:[%s2335_s13 + $0x30] sm:$0xff]  ;;  %3033 = vst [vmem:[#allocation9_spill] sm:$0xff] %v2423_v30  ;;  %v2426_v31 = vld [vmem:[%s2335_s13 + $0x58] sm:$0xff]  ;;  %v2437_v36 = vld [vmem:[%s2335_s13 + $0x40] sm:$0xff]  ;;  %s1804_s7 = sshll.u32 %s2246_s25, 11  ;;  %s1581_s25 = scalar_lea.sflag [#allocation4], %s2329_s29 }
  0x3f   : > { %s1803_s8 = sshll.u32 %s286_s16, 7  ;;  %v2440_v37 = vld [vmem:[%s2335_s13 + $0x50] sm:$0xff]  ;;  %v2451_v44 = vld [vmem:[%s2335_s13 + $0x68] sm:$0xff]  ;;  %v2458_v48 = vld [vmem:[%s2335_s13 + $0x78] sm:$0xff]  ;;  %s1594_s16 = sshll.u32 %s2895_s12, 4  ;;  %s2942_s16 = int_to_ptr.vmem [resolvable:$true] %s1594_s16 }
  0x40   : > { %s2350_s20 = scalar_lea.vmem %s2990_s0, %s1803_s8  ;;  %3036 = vst [vmem:[#allocation12_spill] sm:$0xff] %v2451_v44  ;;  %v2471_v54 = vld [vmem:[%s2335_s13 + $0x60] sm:$0xff]  ;;  %v2474_v55 = vld [vmem:[%s2335_s13 + $0x70] sm:$0xff]  ;;  %s2940_s19 = scalar_lea.hbm %s2996_s6, %s1804_s7 }
  0x41   : > { %v2353_v1 = vld [vmem:[%s2350_s20 + $0x20] sm:$0xff]  ;;  %v2356_v2 = vld [vmem:[%s2350_s20 + $0x28] sm:$0xff]  ;;  %v2370_v7 = vld [vmem:[%s2350_s20 + $0x18] sm:$0xff]  ;;  %3038 = vst [vmem:[#allocation14_spill] sm:$0xff] %v2471_v54  ;;  %p3078_p12 = scmp.ne.s32.totalorder %s3029_s9, 0  ;;  %s2187_s11 = smov [#allocation5]  }
  0x42   : > { %v343_v5 = vadd.f32 %v2359_v3, %v2353_v1  ;;  %v2367_v6 = vld [vmem:[%s2350_s20 + $0x8] sm:$0xff]  ;;  %v344_v8 = vadd.f32 %v2362_v4, %v2356_v2  ;;  %v2381_v11 = vld [vmem:[%s2350_s20] sm:$0xff]  ;;  %v342_v13 = vadd.f32 %v2378_v10, %v2370_v7  ;;  %v2391_v15 = vld [vmem:[%s2350_s20 + $0x10] sm:$0xff]  ;;  %s2117_s14 = sshll.u32 %s2187_s11, 4  ;;  %s2118_s14 = int_to_ptr.vmem [resolvable:$false] %s2117_s14 }
  0x43   : > { %v340_v12 = vadd.f32 %v2375_v9, %v2367_v6  ;;  %v339_v18 = vadd.f32 %v2388_v14, %v2381_v11  ;;  %v2399_v19 = vld [vmem:[%s2350_s20 + $0x30] sm:$0xff]  ;;  %v2402_v20 = vld [vmem:[%s2350_s20 + $0x38] sm:$0xff]  ;;  %v341_v23 = vadd.f32 %v2394_v16, %v2391_v15  ;;  %v2415_v26 = vld [vmem:[%s2350_s20 + $0x48] sm:$0xff]  ;;  %s2119_s15 = scalar_lea.vmem %s2118_s14, 4096  ;;  %p2120_p10 = scmp.lt.s32.totalorder %s2942_s16, %s2118_s14 }
  0x44   : > { %v603_v17 = vadd.f32 %v344_v8, %v343_v5  ;;  %v345_v25 = vadd.f32 %v2405_v21, %v2399_v19  ;;  %3032 = vst [vmem:[#allocation8_spill] sm:$0xff] %v2415_v26  ;;  %v2418_v27 = vld [vmem:[%s2350_s20 + $0x58] sm:$0xff]  ;;  %v346_v29 = vadd.f32 %v2410_v24, %v2402_v20  ;;  %v2429_v32 = vld [vmem:[%s2350_s20 + $0x40] sm:$0xff]  ;;  %v348_v34 = vadd.f32 %v2423_v30, %v2415_v26  ;;  %v2434_v35 = vld [vmem:[%s2350_s20 + $0x50] sm:$0xff] }
  0x45   : > { %v356_v22 = vpack.c.bf16 %v342_v13, %v340_v12  ;;  %v597_v28 = vadd.f32 %v340_v12, %v339_v18  ;;  %3034 = vst [vmem:[#allocation10_spill] sm:$0xff] %v2429_v32  ;;  %v355_v33 = vpack.c.bf16 %v341_v23, %v339_v18  ;;  %v600_v39 = vadd.f32 %v342_v13, %v341_v23  ;;  %v2445_v42 = vld [vmem:[%s2350_s20 + $0x68] sm:$0xff]  ;;  %v2448_v43 = vld [vmem:[%s2350_s20 + $0x78] sm:$0xff]  ;;  %v2461_v49 = vld [vmem:[%s2350_s20 + $0x60] sm:$0xff] }
  0x46   : > { %604 = vadd.xlane.f32.xlu1 %v603_v17  ;;  %v606_v38 = vadd.f32 %v346_v29, %v345_v25  ;;  %v358_v40 = vpack.c.bf16 %v346_v29, %v344_v8  ;;  %v350_v41 = vadd.f32 %v2426_v31, %v2418_v27  ;;  %3035 = vst [vmem:[#allocation11_spill] sm:$0xff] %v2445_v42  ;;  %3037 = vst [vmem:[#allocation13_spill] sm:$0xff] %v2461_v49  ;;  %v2464_v50 = vld [vmem:[%s2350_s20 + $0x70] sm:$0xff]  ;;  %v1924_v8 = vld [vmem:[%s2992_s2] sm:$0xff]   ;;  %v3000_v12 = vmov 0.0   ;;  %s2113_s20 = scalar_lea.vmem %s2942_s16, 2048 }
  0x47   : > { %386 = vmatprep.subr.bf16.mxu0 %v356_v22  ;;  %598 = vadd.xlane.f32.xlu0 %v597_v28  ;;  %v357_v45 = vpack.c.bf16 %v345_v25, %v343_v5  ;;  %v347_v46 = vadd.f32 %v2437_v36, %v2429_v32  ;;  %v349_v47 = vadd.f32 %v2440_v37, %v2434_v35  ;;  %v366_v13 = vld [vmem:[%s2993_s3 + $0x8] sm:$0xff]  ;;  %v365_v17 = vld [vmem:[%s2993_s3] sm:$0xff]  ;;  %v445_v23 = vld [vmem:[%s2995_s5 + $0x10] sm:$0xff]  ;;  %p2114_p6 = scmp.ne.s32.totalorder %s2942_s16, %s2113_s20  ;;  %p2121_p0 = scmp.lt.s32.totalorder %s2119_s15, %s2113_s20 }
  0x48   : > { %387 = vmatpush1.bf16.msra.mxu0 %v355_v33  ;;  %v360_v51 = vpack.c.bf16 %v350_v41, %v348_v34  ;;  %v352_v52 = vadd.f32 %v2451_v44, %v2445_v42  ;;  %v354_v53 = vadd.f32 %v2458_v48, %v2448_v43  ;;  %v353_v58 = vadd.f32 %v2474_v55, %v2464_v50  ;;  %v443_v18 = vld [vmem:[%s2995_s5] sm:$0xff]  ;;  %v444_v22 = vld [vmem:[%s2995_s5 + $0x8] sm:$0xff]  ;;  %v446_v25 = vld [vmem:[%s2995_s5 + $0x18] sm:$0xff] }
  0x49   : > { %388 = vmatprep.subr.bf16.mxu0 %v358_v40  ;;  %v612_v56 = vadd.f32 %v350_v41, %v349_v47  ;;  %v609_v57 = vadd.f32 %v348_v34, %v347_v46  ;;  %v359_v59 = vpack.c.bf16 %v349_v47, %v347_v46  ;;  %v351_v60 = vadd.f32 %v2471_v54, %v2461_v49  ;;  %v447_v28 = vld [vmem:[%s2995_s5 + $0x20] sm:$0xff]  ;;  %v448_v29 = vld [vmem:[%s2995_s5 + $0x28] sm:$0xff]  ;;  %p2115_p13 = pnand %p2114_p6, %p3078_p12  ;;  %p2122_p2 = por %p2121_p0, %p2120_p10 }
  0x4a   : > { %607 = vadd.xlane.f32.xlu1 %v606_v38  ;;  %v362_v61 = vpack.c.bf16 %v354_v53, %v352_v52  ;;  %v618_v62 = vadd.f32 %v354_v53, %v353_v58 }
  0x4b   : > { %601 = vadd.xlane.f32.xlu0 %v600_v39  ;;  %v615_v63 = vadd.f32 %v352_v52, %v351_v60  ;;  %v361_v5 = vpack.c.bf16 %v353_v58, %v351_v60  ;;  %p2116_p8 = pneg %p2115_p13 }
  0x4c   : > { %389 = vmatpush1.bf16.msra.mxu0 %v357_v45 }
  0x4d   : > { %390 = vmatprep.subr.bf16.mxu0 %v360_v51  ;;  %p2123_p4 = pnand %p2122_p2, %p2116_p8 }
  0x4e   : > { %613 = vadd.xlane.f32.xlu1 %v612_v56 }
  0x4f   : > { %610 = vadd.xlane.f32.xlu0 %v609_v57 }
  0x50   : > { %391 = vmatpush1.bf16.msra.mxu0 %v359_v59 }
  0x51   : > { %392 = vmatprep.subr.bf16.mxu0 %v362_v61 }
  0x52   : > { %619 = vadd.xlane.f32.xlu1 %v618_v62 }
  0x53   : > { %616 = vadd.xlane.f32.xlu0 %v615_v63 }
  0x54   : > { %393 = vmatpush1.bf16.msra.mxu0 %v361_v5  ;;  %v2517_v5 = vld [vmem:[%s2992_s2 + $0x8] sm:$0xff]  }
  0x55   : > { %1825 = vmatprep.subr.bf16.mxu0 %v3000_v12  ;;  %3039 = vst [vmem:[#allocation15_spill] sm:$0xff] %v2517_v5 }
  0x57   : > { %1691 = vmatmul.mubr.msk.bf16.vlgmr.msra.gmra.mrb[0].mxu0 %vm382_vm0, %v1924_v8 }
  0x58   : > { %1833 = vmatprep.mubr.msk.bf16.mxu0 %vm2186_vm1, %v3000_v12 }
  0x63   : > { %374 = vperm.xlu1 %1923, %v366_v13  }
  0x67   : > { %453 = vperm.xlu1 %1923, %v443_v18  }
  0x69   : > { %369 = vperm.xlu0 %1922, %v365_v17  }
  0x6b   : > { %458 = vperm.xlu1 %1923, %v444_v22  }
  0x6d   : > { %478 = vperm.xlu0 %1922, %v448_v29  }
  0x6f   : > { %463 = vperm.xlu1 %1923, %v445_v23  }
  0x73   : > { %468 = vperm.xlu1 %1923, %v446_v25  }
  0x77   : > { %473 = vperm.xlu1 %1923, %v447_v28  }
  0xd3   : > { %v605_v33 = vpop.xlane.xlu1 %604 }
  0xd4   : > { %v599_v34 = vpop.xlane.xlu0 %598  ;;  %v624_v46 = vmul.f32 0.00390625, %v605_v33 }
  0xd5   : > { %v622_v40 = vmul.f32 0.00390625, %v599_v34 }
  0xd7   : > { %v608_v38 = vpop.xlane.xlu1 %607 }
  0xd8   : > { %v602_v39 = vpop.xlane.xlu0 %601  ;;  %v625_v47 = vmul.f32 0.00390625, %v608_v38 }
  0xd9   : > { %v623_v41 = vmul.f32 0.00390625, %v602_v39 }
  0xda   : > { %v631_v58 = vpack.c.bf16 %v625_v47, %v624_v46  ;;  %v1926_v46 = vld [vmem:[%s2994_s4] sm:$0xff]   ;;  %v1927_v47 = vld [vmem:[%s2994_s4 + $0x8] sm:$0xff]  }
  0xdb   : > { %v614_v45 = vpop.xlane.xlu1 %613  ;;  %v630_v51 = vpack.c.bf16 %v623_v41, %v622_v40 }
  0xdc   : > { %v611_v52 = vpop.xlane.xlu0 %610  ;;  %v627_v53 = vmul.f32 0.00390625, %v614_v45 }
  0xdd   : > { %1826 = vmatpush3.bf16.msra.mxu0 %v630_v51  ;;  %v626_v56 = vmul.f32 0.00390625, %v611_v52  ;;  %v1928_v51 = vld [vmem:[%s2994_s4 + $0x10] sm:$0xff]   ;;  %v1929_v52 = vld [vmem:[%s2994_s4 + $0x18] sm:$0xff]  }
  0xde   : > { %1827 = vmatprep.subr.bf16.mxu0 %v3000_v12 }
  0xdf   : > { %v620_v57 = vpop.xlane.xlu1 %619  ;;  %v632_v60 = vpack.c.bf16 %v627_v53, %v626_v56  ;;  %v2543_v53 = vld [vmem:[%s2994_s4 + $0x20] sm:$0xff]   ;;  %v2551_v56 = vld [vmem:[%s2993_s3 + $0x10] sm:$0xff] }
  0xe0   : > { %v617_v59 = vpop.xlane.xlu0 %616  ;;  %v629_v61 = vmul.f32 0.00390625, %v620_v57  ;;  %3040 = vst [vmem:[#allocation16_spill] sm:$0xff] %v2543_v53  ;;  %3041 = vst [vmem:[#allocation17_spill] sm:$0xff] %v2551_v56 }
  0xe1   : > { %1828 = vmatpush3.bf16.msra.mxu0 %v631_v58  ;;  %v628_v62 = vmul.f32 0.00390625, %v617_v59  ;;  %v2556_v58 = vld [vmem:[%s2993_s3 + $0x18] sm:$0xff] }
  0xe2   : > { %1829 = vmatprep.subr.bf16.mxu0 %v3000_v12  ;;  %3042 = vst [vmem:[#allocation18_spill] sm:$0xff] %v2556_v58 }
  0xe3   : > { %v633_v63 = vpack.c.bf16 %v629_v61, %v628_v62  ;;  %v375_v17 = vpop.permute.xlu1 %374 }
  0xe5   : > { %1830 = vmatpush3.bf16.msra.mxu0 %v632_v60 }
  0xe6   : > { %1831 = vmatprep.subr.bf16.mxu0 %v3000_v12 }
  0xe8   : > { %v370_v8 = vpop.permute.xlu0 %369 }
  0xe9   : > { %1832 = vmatpush3.bf16.msra.mxu0 %v633_v63 }
  0xec   : > { %1834 = vmatmul.mubr.msk.bf16.vlgmr.msra.gmra.mrb[4].mxu0 %vm382_vm0, %v2517_v5 }
  0xed   : > { %1055 = vmatprep.mubr.bf16.mxu0 %v2998_v0 }
 0x12a   : > { %v420_v13 = vpop.f32.mrb[0].mxu0 }
 0x12b   : > { %v422_v18 = vpop.f32.mrb[1].mxu0  ;;  %v421_v22 = vadd.f32 %v420_v13, %v370_v8 }
 0x12c   : > { %v424_v23 = vpop.f32.mrb[2].mxu0  ;;  %v423_v25 = vadd.f32 %v422_v18, %v370_v8  ;;  %v2563_v18 = vld [vmem:[%s2994_s4 + $0x28] sm:$0xff]  }
 0x12d   : > { %v425_v28 = vadd.f32 %v424_v23, %v375_v17  ;;  %v429_v29 = vmax.f32 %v421_v22, 0.0  ;;  %v426_v33 = vpop.f32.mrb[3].mxu0  ;;  %3043 = vst [vmem:[#allocation19_spill] sm:$0xff] %v2563_v18  ;;  %v2568_v22 = vld [vmem:[%s2994_s4 + $0x30] sm:$0xff]   ;;  %v2577_v23 = vld [vmem:[%s2994_s4 + $0x38] sm:$0xff]  }
 0x12e   : > { %v427_v34 = vadd.f32 %v426_v33, %v375_v17  ;;  %v430_v38 = vmax.f32 %v423_v25, 0.0  ;;  %3044 = vst [vmem:[#allocation20_spill] sm:$0xff] %v2568_v22  ;;  %3045 = vst [vmem:[#allocation21_spill] sm:$0xff] %v2577_v23 }
 0x12f   : > { %v431_v39 = vmax.f32 %v425_v28, 0.0 }
 0x130   : > { %v432_v40 = vmax.f32 %v427_v34, 0.0 }
 0x131   : > { %v441_v41 = vpack.c.bf16 %v431_v39, %v429_v29 }
 0x132   : > { %v442_v45 = vpack.c.bf16 %v432_v40, %v430_v38 }
 0x134   : > { %524 = vmatprep.subr.bf16.mxu1 %v442_v45 }
 0x135   : > { %525 = vmatpush1.bf16.msra.mxu1 %v441_v41 }
 0x138   : > { %1696 = vmatmul.mubr.msk.bf16.vlgmr.msra.gmra.mrb[0].mxu1 %vm511_vm2, %v1926_v46 }
 0x139   : > { %566 = vmatprep.mubr.bf16.mxu1 %v2998_v0 }
 0x140   : > { %1697 = vmatmul.mubr.msk.bf16.gmra.mrb[4].mxu1 %vm511_vm2, %v1927_v47 }
 0x141   : > { %576 = vmatprep.mubr.bf16.mxu1 %v2998_v0 }
 0x148   : > { %1698 = vmatmul.mubr.msk.bf16.gmra.mrb[8].mxu1 %vm511_vm2, %v1928_v51 }
 0x149   : > { %586 = vmatprep.mubr.bf16.mxu1 %v2998_v0 }
 0x150   : > { %1699 = vmatmul.mubr.msk.bf16.gmra.mrb[12].mxu1 %vm511_vm2, %v1929_v52 }
 0x151   : > { %1839 = vmatprep.mubr.msk.bf16.mxu1 %vm511_vm2, %v2543_v53 }
 0x1bf   : > { %v682_v57 = vpop.f32.mrb[4].mxu0 }
 0x1c0   : > { %v683_v59 = vadd.f32 %v2551_v56, %v682_v57  ;;  %v1835_v60 = vpop.f32.mrb[5].mxu0 }
 0x1c1   : > { %v685_v61 = vpop.f32.mrb[6].mxu0  ;;  %v2609_v60 = vld [vmem:[%s2995_s5 + $0x50] sm:$0xff] }
 0x1c2   : > { %v686_v62 = vadd.f32 %v2556_v58, %v685_v61  ;;  %v1836_v63 = vpop.f32.mrb[7].mxu0  ;;  %v689_v8 = vmax.f32 %v683_v59, 0.0  ;;  %3046 = vst [vmem:[#allocation22_spill] sm:$0xff] %v2609_v60 }
 0x1c4   : > { %v690_v13 = vmax.f32 %v686_v62, 0.0  ;;  %v2614_v62 = vld [vmem:[%s2995_s5 + $0x58] sm:$0xff] }
 0x1c5   : > { %3047 = vst [vmem:[#allocation23_spill] sm:$0xff] %v2614_v62 }
 0x1c6   : > { %v700_v17 = vpack.c.bf16 %v690_v13, %v689_v8  ;;  %v2620_v13 = vld [vmem:[%s2995_s5 + $0x40] sm:$0xff] }
 0x1c7   : > { %3048 = vst [vmem:[#allocation24_spill] sm:$0xff] %v2620_v13 }
 0x1c8   : > { %1837 = vmatprep.subr.bf16.mxu1 %v700_v17 }
 0x1c9   : > { %1838 = vmatpush3.bf16.msra.mxu1 %v700_v17 }
 0x1cc   : > { %1840 = vmatmul.mubr.msk.bf16.vlgmr.msra.gmra.mrb[16].mxu1 %vm511_vm2, %v2563_v18 }
 0x1cd   : > { %1843 = vmatprep.mubr.msk.bf16.mxu1 %vm511_vm2, %v2568_v22  ;;  %v2627_v22 = vld [vmem:[%s2995_s5 + $0x48] sm:$0xff] }
 0x1ce   : > { %3049 = vst [vmem:[#allocation25_spill] sm:$0xff] %v2627_v22 }
 0x1d4   : > { %1844 = vmatmul.mubr.msk.bf16.gmra.mrb[20].mxu1 %vm511_vm2, %v2577_v23 }
 0x1d5   : > { %1194 = vmatprep.mubr.bf16.mxu1 %v2998_v0 }
 0x20b   : > { %v2582_v25 = vpop.f32.mrb[0].mxu1 }
 0x20c   : > { %v2584_v28 = vpop.f32.mrb[1].mxu1 }
 0x20d   : > { %v2586_v29 = vpop.f32.mrb[2].mxu1 }
 0x20e   : > { %v2588_v33 = vpop.f32.mrb[3].mxu1 }
 0x213   : > { %v568_v34 = vpop.f32.mrb[4].mxu1 }
 0x214   : > { %v570_v38 = vpop.f32.mrb[5].mxu1 }
 0x215   : > { %v572_v39 = vpop.f32.mrb[6].mxu1 }
 0x216   : > { %v574_v40 = vpop.f32.mrb[7].mxu1 }
 0x21b   : > { %v2590_v41 = vpop.f32.mrb[8].mxu1 }
 0x21c   : > { %v2592_v45 = vpop.f32.mrb[9].mxu1 }
 0x21d   : > { %v2594_v46 = vpop.f32.mrb[10].mxu1 }
 0x21e   : > { %v2596_v47 = vpop.f32.mrb[11].mxu1 }
 0x223   : > { %v2598_v51 = vpop.f32.mrb[12].mxu1 }
 0x224   : > { %v2600_v52 = vpop.f32.mrb[13].mxu1 }
 0x225   : > { %v2602_v57 = vpop.f32.mrb[14].mxu1 }
 0x226   : > { %v2604_v59 = vpop.f32.mrb[15].mxu1 }
 0x29f   : > { %v1841_v61 = vpop.f32.mrb[16].mxu1 }
 0x2a0   : > { %v785_v63 = vadd.f32 %v1841_v61, %v2609_v60  ;;  %v776_v8 = vpop.f32.mrb[17].mxu1  ;;  %v450_v61 = vld [vmem:[%s2995_s5 + $0x38] sm:$0xff] }
 0x2a1   : > { %v1842_v17 = vpop.f32.mrb[18].mxu1  ;;  %v777_v23 = vadd.f32 %v2620_v13, %v776_v8 }
 0x2a2   : > { %v788_v0 = vadd.f32 %v1842_v17, %v2614_v62  ;;  %819 = vperm.xlu1 %1923, %v785_v63   ;;  %v779_v12 = vpop.f32.mrb[19].mxu1  ;;  %v2636_v63 = vld [vmem:[%s2995_s5 + $0x68] sm:$0xff]  ;;  %v449_v62 = vld [vmem:[%s2995_s5 + $0x30] sm:$0xff] }
 0x2a3   : > { %v780_v18 = vadd.f32 %v2627_v22, %v779_v12  ;;  %3050 = vst [vmem:[#allocation26_spill] sm:$0xff] %v2636_v63  ;;  %v2645_v12 = vld [vmem:[%s2995_s5 + $0x78] sm:$0xff]  ;;  %v454_v22 = vpop.permute.xlu1 %453 }
 0x2a4   : > { %824 = vperm.xlu0 %1922, %v788_v0   ;;  %3051 = vst [vmem:[#allocation27_spill] sm:$0xff] %v2645_v12  ;;  %v561_v54 = vadd.f32 %v2584_v28, %v454_v22 }
 0x2a6   : > { %809 = vperm.xlu1 %1923, %v777_v23   ;;  %v2650_v23 = vld [vmem:[%s2995_s5 + $0x60] sm:$0xff] }
 0x2a7   : > { %v1845_v60 = vpop.f32.mrb[20].mxu1  ;;  %3052 = vst [vmem:[#allocation28_spill] sm:$0xff] %v2650_v23  ;;  %v459_v58 = vpop.permute.xlu1 %458 }
 0x2a8   : > { %488 = vperm.xlu0 %1922, %v450_v61   ;;  %v792_v17 = vpop.f32.mrb[21].mxu1 }
 0x2a9   : > { %v1846_v0 = vpop.f32.mrb[22].mxu1  ;;  %v793_v61 = vadd.f32 %v2650_v23, %v792_v17 }
 0x2aa   : > { %v795_v8 = vpop.f32.mrb[23].mxu1  ;;  %814 = vperm.xlu1 %1923, %v780_v18   ;;  %v804_v18 = vadd.f32 %v1846_v0, %v2645_v12 }
 0x2ab   : > { %v796_v13 = vadd.f32 %v2636_v63, %v795_v8  ;;  %v2657_v8 = vld [vmem:[%s2995_s5 + $0x70] sm:$0xff]  ;;  %v464_v56 = vpop.permute.xlu1 %463 }
 0x2ac   : > { %3053 = vst [vmem:[#allocation29_spill] sm:$0xff] %v2657_v8  ;;  %v801_v63 = vadd.f32 %v1845_v60, %v2657_v8  ;;  %v569_v0 = vadd.f32 %v568_v34, %v464_v56  ;;  %v571_v12 = vadd.f32 %v570_v38, %v464_v56 }
 0x2ad   : > { %834 = vperm.xlu0 %1922, %v796_v13  }
 0x2ae   : > { %483 = vperm.xlu1 %1923, %v449_v62   ;;  %v479_v62 = vpop.permute.xlu0 %478 }
 0x2af   : > { %v469_v53 = vpop.permute.xlu1 %468  ;;  %v585_v28 = vadd.f32 %v2596_v47, %v479_v62 }
 0x2b0   : > { %v573_v23 = vadd.f32 %v572_v39, %v469_v53  ;;  %v575_v5 = vadd.f32 %v574_v40, %v469_v53  ;;  %v563_v53 = vadd.f32 %v2586_v29, %v459_v58  ;;  %v565_v39 = vadd.f32 %v2588_v33, %v459_v58 }
 0x2b1   : > { %844 = vperm.xlu0 %1922, %v804_v18   ;;  %v559_v18 = vadd.f32 %v2582_v25, %v454_v22 }
 0x2b2   : > { %829 = vperm.xlu1 %1923, %v793_v61  }
 0x2b3   : > { %v2660_v13 = vpop.permute.xlu1 %473 }
 0x2b6   : > { %839 = vperm.xlu1 %1923, %v801_v63  }
 0x321   : > { %v820_v17 = vpop.permute.xlu1 %819 }
 0x322   : > { %v851_v42 = vadd.f32 %v820_v17, %v569_v0  ;;  %v852_v44 = vadd.f32 %v820_v17, %v571_v12 }
 0x323   : > { %v825_v61 = vpop.permute.xlu0 %824 }
 0x324   : > { %v1734_v49 = vmul.f32 -1.442695, %v851_v42  ;;  %v1735_v60 = vmul.f32 -1.442695, %v852_v44  ;;  %v853_v63 = vadd.f32 %v825_v61, %v573_v23  ;;  %v854_v8 = vadd.f32 %v825_v61, %v575_v5 }
 0x325   : > { %v810_v26 = vpop.permute.xlu1 %809 }
 0x326   : > { %1939 = vpow2.f32 %v1734_v49  ;;  %v1736_v30 = vmul.f32 -1.442695, %v853_v63  ;;  %v1737_v32 = vmul.f32 -1.442695, %v854_v8  ;;  %v847_v34 = vadd.f32 %v810_v26, %v559_v18 }
 0x327   : > { %1941 = vpow2.f32 %v1735_v60  ;;  %v848_v56 = vadd.f32 %v810_v26, %v561_v54  ;;  %v489_v38 = vpop.permute.xlu0 %488  ;;  %v583_v49 = vadd.f32 %v2594_v46, %v479_v62 }
 0x328   : > { %1943 = vpow2.f32 %v1736_v30  ;;  %v1730_v25 = vmul.f32 -1.442695, %v847_v34  ;;  %v593_v30 = vadd.f32 %v2602_v57, %v489_v38  ;;  %v595_v8 = vadd.f32 %v2604_v59, %v489_v38 }
 0x329   : > { %1945 = vpow2.f32 %v1737_v32  ;;  %v1731_v42 = vmul.f32 -1.442695, %v848_v56  ;;  %v815_v44 = vpop.permute.xlu1 %814  ;;  %v579_v57 = vadd.f32 %v2590_v41, %v2660_v13 }
 0x32a   : > { %1947 = vpow2.f32 %v1730_v25  ;;  %v849_v5 = vadd.f32 %v815_v44, %v563_v53  ;;  %v850_v22 = vadd.f32 %v815_v44, %v565_v39 }
 0x32b   : > { %1949 = vpow2.f32 %v1731_v42  ;;  %v581_v42 = vadd.f32 %v2592_v45, %v2660_v13  ;;  %v2678_v45 = vsub.f32 %v2353_v1, %v2359_v3  ;;  %v2690_v1 = vsub.f32 %v2402_v20, %v2410_v24 }
 0x32c   : > { %v1732_v40 = vmul.f32 -1.442695, %v849_v5  ;;  %v1733_v26 = vmul.f32 -1.442695, %v850_v22  ;;  %v835_v54 = vpop.permute.xlu0 %834 }
 0x32d   : > { %v857_v12 = vadd.f32 %v835_v54, %v583_v49  ;;  %v858_v29 = vadd.f32 %v835_v54, %v585_v28  ;;  %v484_v23 = vpop.permute.xlu1 %483 }
 0x32e   : > { %1951 = vpow2.f32 %v1732_v40  ;;  %v589_v41 = vadd.f32 %v2598_v51, %v484_v23  ;;  %v591_v28 = vadd.f32 %v2600_v52, %v484_v23  ;;  %v2682_v51 = vsub.f32 %v2356_v2, %v2362_v4 }
 0x32f   : > { %1953 = vpow2.f32 %v1733_v26  ;;  %v1740_v32 = vmul.f32 -1.442695, %v857_v12  ;;  %v1741_v58 = vmul.f32 -1.442695, %v858_v29  ;;  %v2686_v23 = vsub.f32 %v2399_v19, %v2405_v21 }
 0x330   : > { %v1940_v33 = vpop.eup %1939  ;;  %v845_v0 = vpop.permute.xlu0 %844  ;;  %v2694_v2 = vsub.f32 %v2381_v11, %v2388_v14 }
 0x331   : > { %v1942_v46 = vpop.eup %1941  ;;  %v915_v17 = vadd.f32 1.0, %v1940_v33  ;;  %1955 = vpow2.f32 %v1740_v32  ;;  %v861_v47 = vadd.f32 %v845_v0, %v593_v30  ;;  %v830_v62 = vpop.permute.xlu1 %829  ;;  %v862_v60 = vadd.f32 %v845_v0, %v595_v8 }
 0x332   : > { %v1944_v18 = vpop.eup %1943  ;;  %v916_v61 = vadd.f32 1.0, %v1942_v46  ;;  %1957 = vpow2.f32 %v1741_v58  ;;  %v855_v25 = vadd.f32 %v830_v62, %v579_v57  ;;  %v856_v40 = vadd.f32 %v830_v62, %v581_v42 }
 0x333   : > { %v1946_v63 = vpop.eup %1945  ;;  %1959 = vrcp.f32 %v915_v17  ;;  %v917_v34 = vadd.f32 1.0, %v1944_v18  ;;  %v1744_v39 = vmul.f32 -1.442695, %v861_v47  ;;  %v1745_v5 = vmul.f32 -1.442695, %v862_v60 }
 0x334   : > { %v1948_v56 = vpop.eup %1947  ;;  %1961 = vrcp.f32 %v916_v61  ;;  %v918_v53 = vadd.f32 1.0, %v1946_v63  ;;  %v1738_v12 = vmul.f32 -1.442695, %v855_v25  ;;  %v1739_v33 = vmul.f32 -1.442695, %v856_v40 }
 0x335   : > { %v1950_v59 = vpop.eup %1949  ;;  %1963 = vrcp.f32 %v917_v34  ;;  %v911_v38 = vadd.f32 1.0, %v1948_v56  ;;  %v840_v22 = vpop.permute.xlu1 %839  ;;  %v2699_v18 = vsub.f32 %v2367_v6, %v2375_v9  ;;  %v2710_v6 = vsub.f32 %v2391_v15, %v2394_v16 }
 0x336   : > { %1965 = vrcp.f32 %v918_v53  ;;  %v912_v44 = vadd.f32 1.0, %v1950_v59  ;;  %v859_v29 = vadd.f32 %v840_v22, %v589_v41  ;;  %v860_v30 = vadd.f32 %v840_v22, %v591_v28 }
 0x337   : > { %1967 = vrcp.f32 %v911_v38 }
 0x338   : > { %v1952_v49 = vpop.eup %1951  ;;  %1969 = vrcp.f32 %v912_v44  ;;  %v1742_v46 = vmul.f32 -1.442695, %v859_v29  ;;  %v1743_v47 = vmul.f32 -1.442695, %v860_v30 }
 0x339   : > { %v1954_v26 = vpop.eup %1953  ;;  %v913_v54 = vadd.f32 1.0, %v1952_v49  ;;  %1971 = vpow2.f32 %v1744_v39 }
 0x33a   : > { %v914_v13 = vadd.f32 1.0, %v1954_v26  ;;  %1973 = vpow2.f32 %v1745_v5  ;;  %v2731_v26 = vsub.f32 %v2418_v27, %v2426_v31 }
 0x33b   : > { %v1956_v32 = vpop.eup %1955  ;;  %1975 = vrcp.f32 %v913_v54 }
 0x33c   : > { %v1958_v52 = vpop.eup %1957  ;;  %1977 = vrcp.f32 %v914_v13  ;;  %v921_v58 = vadd.f32 1.0, %v1956_v32 }
 0x33d   : > { %v1960_v8 = vpop.eup %1959  ;;  %v922_v0 = vadd.f32 1.0, %v1958_v52  ;;  %1979 = vpow2.f32 %v1738_v12 }
 0x33e   : > { %v1962_v17 = vpop.eup %1961  ;;  %1981 = vrcp.f32 %v921_v58  ;;  %v963_v19 = vmul.f32 %v1960_v8, %v2678_v45 }
 0x33f   : > { %v1964_v62 = vpop.eup %1963  ;;  %1983 = vrcp.f32 %v922_v0  ;;  %v964_v20 = vmul.f32 %v1962_v17, %v2682_v51 }
 0x340   : > { %v1966_v61 = vpop.eup %1965  ;;  %1985 = vpow2.f32 %v1739_v33  ;;  %v965_v60 = vmul.f32 %v1964_v62, %v2686_v23  ;;  %v2704_v63 = vadd.f32 %v963_v19, %v2359_v3  ;;  %v2716_v3 = vsub.f32 %v2370_v7, %v2378_v10 }
 0x341   : > { %v1968_v11 = vpop.eup %1967  ;;  %1987 = vpow2.f32 %v1742_v46  ;;  %v966_v57 = vmul.f32 %v1966_v61, %v2690_v1  ;;  %v980_v34 = vadd.f32 %v964_v20, %v2362_v4  ;;  %v2746_v61 = vsub.f32 %v2448_v43, %v2458_v48  ;;  %v3055_v43 = vld [vmem:[#allocation9_spill] sm:$0xff] }
 0x342   : > { %v1970_v56 = vpop.eup %1969  ;;  %1989 = vpow2.f32 %v1743_v47  ;;  %v959_v53 = vmul.f32 %v1968_v11, %v2694_v2  ;;  %v981_v59 = vadd.f32 %v965_v60, %v2405_v21  ;;  %v2725_v21 = vsub.f32 %v2434_v35, %v2440_v37  ;;  %v3054_v60 = vld [vmem:[#allocation10_spill] sm:$0xff] }
 0x343   : > { %v1972_v38 = vpop.eup %1971  ;;  %v960_v39 = vmul.f32 %v1970_v56, %v2699_v18  ;;  %v982_v25 = vadd.f32 %v966_v57, %v2410_v24  ;;  %v1241_v4 = vadd.f32 %v980_v34, %v2704_v63  ;;  %v3056_v56 = vld [vmem:[#allocation8_spill] sm:$0xff] }
 0x344   : > { %v1974_v42 = vpop.eup %1973  ;;  %v925_v44 = vadd.f32 1.0, %v1972_v38  ;;  %v975_v15 = vadd.f32 %v959_v53, %v2388_v14  ;;  %v993_v5 = vpack.c.bf16 %v981_v59, %v2704_v63  ;;  %v2750_v63 = vsub.f32 %v3054_v60, %v2437_v36 }
 0x345   : > { %v1976_v22 = vpop.eup %1975  ;;  %v926_v41 = vadd.f32 1.0, %v1974_v42  ;;  %v976_v7 = vadd.f32 %v960_v39, %v2375_v9  ;;  %v1244_v49 = vadd.f32 %v982_v25, %v981_v59  ;;  %v994_v28 = vpack.c.bf16 %v982_v25, %v980_v34  ;;  %v3057_v39 = vld [vmem:[#allocation14_spill] sm:$0xff]  ;;  %v3058_v25 = vld [vmem:[#allocation13_spill] sm:$0xff] }
 0x346   : > { %v1978_v40 = vpop.eup %1977  ;;  %1991 = vrcp.f32 %v925_v44  ;;  %v961_v24 = vmul.f32 %v1976_v22, %v2710_v6  ;;  %v2757_v53 = vsub.f32 %v3056_v56, %v3055_v43  ;;  %v3059_v44 = vld [vmem:[#allocation12_spill] sm:$0xff] }
 0x347   : > { %v1980_v14 = vpop.eup %1979  ;;  %1993 = vrcp.f32 %v926_v41  ;;  %v1235_v54 = vadd.f32 %v976_v7, %v975_v15  ;;  %v962_v35 = vmul.f32 %v1978_v40, %v2716_v3 }
 0x348   : > { %v1982_v12 = vpop.eup %1981  ;;  %v919_v29 = vadd.f32 1.0, %v1980_v14  ;;  %v977_v13 = vadd.f32 %v961_v24, %v2394_v16 }
 0x349   : > { %v1984_v9 = vpop.eup %1983  ;;  %1236 = vadd.xlane.f32.xlu1 %v1235_v54  ;;  %v978_v30 = vadd.f32 %v962_v35, %v2378_v10  ;;  %v969_v32 = vmul.f32 %v1982_v12, %v2725_v21  ;;  %v2742_v10 = vsub.f32 %v2464_v50, %v2474_v55 }
 0x34a   : > { %v1986_v52 = vpop.eup %1985  ;;  %1995 = vrcp.f32 %v919_v29  ;;  %v991_v58 = vpack.c.bf16 %v977_v13, %v975_v15  ;;  %v970_v27 = vmul.f32 %v1984_v9, %v2731_v26  ;;  %v3060_v15 = vld [vmem:[#allocation11_spill] sm:$0xff]  ;;  %v1934_v9 = vld [vmem:[%s2992_s2 + $0x10] sm:$0xff]  }
 0x34b   : > { %v1988_v33 = vpop.eup %1987  ;;  %v920_v8 = vadd.f32 1.0, %v1986_v52  ;;  %v1238_v0 = vadd.f32 %v978_v30, %v977_v13  ;;  %v992_v46 = vpack.c.bf16 %v978_v30, %v976_v7  ;;  %v985_v17 = vadd.f32 %v969_v32, %v2440_v37  ;;  %v1749_v32 = vld [vmem:[%s2993_s3 + $0x28] sm:$0xff]  ;;  %v1760_v52 = vld [vmem:[%s2995_s5 + $0x80] sm:$0xff] }
 0x34c   : > { %v1990_v47 = vpop.eup %1989  ;;  %v923_v19 = vadd.f32 1.0, %v1988_v33  ;;  %v986_v16 = vadd.f32 %v970_v27, %v2426_v31  ;;  %v3061_v30 = vmov 0.0   ;;  %v1764_v27 = vld [vmem:[%s2995_s5 + $0xa0] sm:$0xff] }
 0x34d   : > { %1997 = vrcp.f32 %v920_v8  ;;  %v924_v62 = vadd.f32 1.0, %v1990_v47  ;;  %1239 = vadd.xlane.f32.xlu0 %v1238_v0  ;;  %1023 = vmatprep.subr.bf16.mxu0 %v992_v46  ;;  %v1748_v33 = vld [vmem:[%s2993_s3 + $0x20] sm:$0xff]  ;;  %v1766_v8 = vld [vmem:[%s2995_s5 + $0xb0] sm:$0xff]  ;;  %v1761_v0 = vld [vmem:[%s2995_s5 + $0x88] sm:$0xff] }
 0x34e   : > { %1999 = vrcp.f32 %v923_v19  ;;  %1245 = vadd.xlane.f32.xlu1 %v1244_v49  ;;  %1024 = vmatpush1.bf16.msra.mxu0 %v991_v58  ;;  %v1250_v20 = vadd.f32 %v986_v16, %v985_v17  ;;  %v1762_v58 = vld [vmem:[%s2995_s5 + $0x90] sm:$0xff]  ;;  %v1763_v46 = vld [vmem:[%s2995_s5 + $0x98] sm:$0xff] }
 0x34f   : > { %2001 = vrcp.f32 %v924_v62  ;;  %1025 = vmatprep.subr.bf16.mxu0 %v994_v28  ;;  %v1767_v47 = vld [vmem:[%s2995_s5 + $0xb8] sm:$0xff] }
 0x350   : > { %v1992_v37 = vpop.eup %1991 }
 0x351   : > { %v1994_v31 = vpop.eup %1993  ;;  %1242 = vadd.xlane.f32.xlu0 %v1241_v4  ;;  %v973_v50 = vmul.f32 %v1992_v37, %v2742_v10  ;;  %v2763_v4 = vsub.f32 %v3058_v25, %v3057_v39 }
 0x352   : > { %1251 = vadd.xlane.f32.xlu1 %v1250_v20  ;;  %1026 = vmatpush1.bf16.msra.mxu0 %v993_v5  ;;  %v974_v11 = vmul.f32 %v1994_v31, %v2746_v61  ;;  %v2767_v5 = vsub.f32 %v3060_v15, %v3059_v44 }
 0x353   : > { %v989_v57 = vadd.f32 %v973_v50, %v2474_v55 }
 0x354   : > { %v1996_v34 = vpop.eup %1995  ;;  %v990_v59 = vadd.f32 %v974_v11, %v2458_v48 }
 0x355   : > { %v967_v38 = vmul.f32 %v1996_v34, %v2750_v63 }
 0x356   : > { %v1256_v42 = vadd.f32 %v990_v59, %v989_v57 }
 0x357   : > { %v1998_v22 = vpop.eup %1997  ;;  %v983_v55 = vadd.f32 %v967_v38, %v2437_v36 }
 0x358   : > { %v2000_v41 = vpop.eup %1999  ;;  %v968_v7 = vmul.f32 %v1998_v22, %v2757_v53  ;;  %1257 = vadd.xlane.f32.xlu1 %v1256_v42  ;;  %v3062_v22 = vld [vmem:[#allocation15_spill] sm:$0xff] }
 0x359   : > { %v2002_v49 = vpop.eup %2001  ;;  %v995_v48 = vpack.c.bf16 %v985_v17, %v983_v55  ;;  %v971_v28 = vmul.f32 %v2000_v41, %v2763_v4  ;;  %v1765_v17 = vld [vmem:[%s2995_s5 + $0xa8] sm:$0xff] }
 0x35a   : > { %v984_v40 = vadd.f32 %v968_v7, %v3055_v43  ;;  %v972_v24 = vmul.f32 %v2002_v49, %v2767_v5 }
 0x35b   : > { %v987_v14 = vadd.f32 %v971_v28, %v3057_v39 }
 0x35c   : > { %v1247_v54 = vadd.f32 %v984_v40, %v983_v55  ;;  %v996_v35 = vpack.c.bf16 %v986_v16, %v984_v40  ;;  %v988_v12 = vadd.f32 %v972_v24, %v3059_v44  ;;  %v3063_v55 = vld [vmem:[#allocation16_spill] sm:$0xff] }
 0x35d   : > { %v997_v29 = vpack.c.bf16 %v989_v57, %v987_v14 }
 0x35e   : > { %1248 = vadd.xlane.f32.xlu0 %v1247_v54  ;;  %1027 = vmatprep.subr.bf16.mxu0 %v996_v35  ;;  %v1253_v36 = vadd.f32 %v988_v12, %v987_v14  ;;  %v998_v13 = vpack.c.bf16 %v990_v59, %v988_v12 }
 0x35f   : > { %1028 = vmatpush1.bf16.msra.mxu0 %v995_v48 }
 0x360   : > { %1029 = vmatprep.subr.bf16.mxu0 %v998_v13 }
 0x362   : > { %1254 = vadd.xlane.f32.xlu0 %v1253_v36 }
 0x363   : > { %1030 = vmatpush1.bf16.msra.mxu0 %v997_v29 }
 0x364   : > { %1847 = vmatprep.subr.bf16.mxu0 %v3061_v30 }
 0x366   : > { %1751 = vmatmul.mubr.msk.bf16.vlgmr.msra.gmra.mrb[8].mxu0 %vm382_vm0, %v1934_v9 }
 0x367   : > { %1855 = vmatprep.mubr.msk.bf16.mxu0 %vm2186_vm1, %v3061_v30 }
 0x369   : > { %1012 = vperm.xlu1 %1923, %v1749_v32   ;;  %v1935_v32 = vld [vmem:[%s2994_s4 + $0x40] sm:$0xff]  }
 0x36d   : > { %1092 = vperm.xlu1 %1923, %v1760_v52   ;;  %v3064_v52 = vmov 0  }
 0x371   : > { %1102 = vperm.xlu1 %1923, %v1762_v58   ;;  %v1936_v58 = vld [vmem:[%s2994_s4 + $0x48] sm:$0xff]  }
 0x375   : > { %1112 = vperm.xlu1 %1923, %v1764_v27   ;;  %v1937_v27 = vld [vmem:[%s2994_s4 + $0x50] sm:$0xff]  }
 0x378   : > { %1007 = vperm.xlu0 %1922, %v1748_v33   ;;  %v1938_v33 = vld [vmem:[%s2994_s4 + $0x58] sm:$0xff]  }
 0x379   : > { %1122 = vperm.xlu1 %1923, %v1766_v8  }
 0x37c   : > { %1097 = vperm.xlu0 %1922, %v1761_v0   ;;  %v3065_v0 = vld [vmem:[#allocation17_spill] sm:$0xff] }
 0x380   : > { %1107 = vperm.xlu0 %1922, %v1763_v46  }
 0x384   : > { %1117 = vperm.xlu0 %1922, %v1765_v17  }
 0x388   : > { %1127 = vperm.xlu0 %1922, %v1767_v47  }
 0x3d6   : > { %v1237_v19 = vpop.xlane.xlu1 %1236 }
 0x3d7   : > { %v1259_v62 = vmul.f32 0.00390625, %v1237_v19  ;;  %v3066_v19 = vld [vmem:[#allocation18_spill] sm:$0xff] }
 0x3da   : > { %v1240_v16 = vpop.xlane.xlu0 %1239 }
 0x3db   : > { %v1260_v20 = vmul.f32 0.00390625, %v1240_v16  ;;  %v1246_v37 = vpop.xlane.xlu1 %1245 }
 0x3dc   : > { %v1262_v50 = vmul.f32 0.00390625, %v1246_v37 }
 0x3dd   : > { %v1267_v31 = vpack.c.bf16 %v1260_v20, %v1259_v62 }
 0x3de   : > { %v1243_v60 = vpop.xlane.xlu0 %1242 }
 0x3df   : > { %v1261_v11 = vmul.f32 0.00390625, %v1243_v60  ;;  %1848 = vmatpush3.bf16.msra.mxu0 %v1267_v31  ;;  %v1252_v34 = vpop.xlane.xlu1 %1251  ;;  %v3067_v60 = vld [vmem:[#allocation19_spill] sm:$0xff] }
 0x3e0   : > { %1849 = vmatprep.subr.bf16.mxu0 %v3061_v30  ;;  %v1264_v56 = vmul.f32 0.00390625, %v1252_v34 }
 0x3e1   : > { %v1268_v57 = vpack.c.bf16 %v1262_v50, %v1261_v11  ;;  %v3068_v50 = vld [vmem:[#allocation20_spill] sm:$0xff]  ;;  %v3069_v11 = vld [vmem:[#allocation21_spill] sm:$0xff] }
 0x3e3   : > { %1850 = vmatpush3.bf16.msra.mxu0 %v1268_v57 }
 0x3e4   : > { %1851 = vmatprep.subr.bf16.mxu0 %v3061_v30 }
 0x3e5   : > { %v1258_v38 = vpop.xlane.xlu1 %1257 }
 0x3e6   : > { %v1266_v42 = vmul.f32 0.00390625, %v1258_v38 }
 0x3e9   : > { %v1013_v28 = vpop.permute.xlu1 %1012 }
 0x3eb   : > { %v1249_v43 = vpop.xlane.xlu0 %1248 }
 0x3ec   : > { %v1263_v59 = vmul.f32 0.00390625, %v1249_v43 }
 0x3ee   : > { %v1269_v39 = vpack.c.bf16 %v1264_v56, %v1263_v59 }
 0x3ef   : > { %v1255_v25 = vpop.xlane.xlu0 %1254 }
 0x3f0   : > { %v1265_v44 = vmul.f32 0.00390625, %v1255_v25  ;;  %1852 = vmatpush3.bf16.msra.mxu0 %v1269_v39 }
 0x3f1   : > { %1853 = vmatprep.subr.bf16.mxu0 %v3061_v30 }
 0x3f2   : > { %v1270_v15 = vpack.c.bf16 %v1266_v42, %v1265_v44 }
 0x3f4   : > { %1854 = vmatpush3.bf16.msra.mxu0 %v1270_v15 }
 0x3f7   : > { %1856 = vmatmul.mubr.msk.bf16.vlgmr.msra.gmra.mrb[12].mxu0 %vm382_vm0, %v3062_v22  ;;  %v1008_v41 = vpop.permute.xlu0 %1007 }
 0x3f8   : > { %1861 = vmatprep.mubr.msk.bf16.mxu0 %vm511_vm2, %v3063_v55 }
 0x439   : > { %v1057_v7 = vpop.f32.mrb[8].mxu0 }
 0x43a   : > { %v1058_v49 = vadd.f32 %v1057_v7, %v1008_v41  ;;  %v1059_v48 = vpop.f32.mrb[9].mxu0 }
 0x43b   : > { %v1060_v40 = vadd.f32 %v1059_v48, %v1008_v41  ;;  %v1061_v24 = vpop.f32.mrb[10].mxu0 }
 0x43c   : > { %v1062_v14 = vadd.f32 %v1061_v24, %v1013_v28  ;;  %v1063_v54 = vpop.f32.mrb[11].mxu0  ;;  %v1066_v12 = vmax.f32 %v1058_v49, 0.0 }
 0x43d   : > { %v1064_v35 = vadd.f32 %v1063_v54, %v1013_v28  ;;  %v1067_v36 = vmax.f32 %v1060_v40, 0.0  ;;  %v3070_v28 = vld [vmem:[#allocation22_spill] sm:$0xff]  ;;  %v3071_v54 = vld [vmem:[#allocation23_spill] sm:$0xff] }
 0x43e   : > { %v1068_v29 = vmax.f32 %v1062_v14, 0.0 }
 0x43f   : > { %v1069_v13 = vmax.f32 %v1064_v35, 0.0 }
 0x440   : > { %v1079_v9 = vpack.c.bf16 %v1068_v29, %v1066_v12  ;;  %v3072_v29 = vld [vmem:[#allocation24_spill] sm:$0xff] }
 0x441   : > { %v1080_v30 = vpack.c.bf16 %v1069_v13, %v1067_v36  ;;  %v3073_v13 = vld [vmem:[#allocation25_spill] sm:$0xff] }
 0x443   : > { %1162 = vmatprep.subr.bf16.mxu1 %v1080_v30 }
 0x444   : > { %1163 = vmatpush1.bf16.msra.mxu1 %v1079_v9 }
 0x447   : > { %1772 = vmatmul.mubr.msk.bf16.vlgmr.msra.gmra.mrb[24].mxu1 %vm511_vm2, %v1935_v32 }
 0x448   : > { %1204 = vmatprep.mubr.bf16.mxu1 %v3064_v52 }
 0x44f   : > { %1773 = vmatmul.mubr.msk.bf16.gmra.mrb[28].mxu1 %vm511_vm2, %v1936_v58 }
 0x450   : > { %1214 = vmatprep.mubr.bf16.mxu1 %v3064_v52 }
 0x457   : > { %1774 = vmatmul.mubr.msk.bf16.gmra.mrb[32].mxu1 %vm511_vm2, %v1937_v27 }
 0x458   : > { %1224 = vmatprep.mubr.bf16.mxu1 %v3064_v52  ;;  %v3074_v52 = vld [vmem:[#allocation28_spill] sm:$0xff] }
 0x45f   : > { %1775 = vmatmul.mubr.msk.bf16.gmra.mrb[36].mxu1 %vm511_vm2, %v1938_v33 }
 0x4ca   : > { %v1305_v8 = vpop.f32.mrb[12].mxu0 }
 0x4cb   : > { %v1306_v46 = vadd.f32 %v3065_v0, %v1305_v8  ;;  %v1857_v17 = vpop.f32.mrb[13].mxu0  ;;  %v3075_v8 = vld [vmem:[#allocation26_spill] sm:$0xff] }
 0x4cc   : > { %v1308_v47 = vpop.f32.mrb[14].mxu0 }
 0x4cd   : > { %v1309_v16 = vadd.f32 %v3066_v19, %v1308_v47  ;;  %v1858_v62 = vpop.f32.mrb[15].mxu0  ;;  %v1312_v20 = vmax.f32 %v1306_v46, 0.0  ;;  %v3076_v46 = vld [vmem:[#allocation29_spill] sm:$0xff]  ;;  %v3077_v47 = vld [vmem:[#allocation27_spill] sm:$0xff] }
 0x4ce   : > { %v1098_v62 = vpop.permute.xlu0 %1097 }
 0x4cf   : > { %v1313_v37 = vmax.f32 %v1309_v16, 0.0  ;;  %v1093_v16 = vpop.permute.xlu1 %1092 }
 0x4d1   : > { %v1314_v31 = vpack.c.bf16 %v1313_v37, %v1312_v20 }
 0x4d2   : > { %v1108_v37 = vpop.permute.xlu0 %1107 }
 0x4d3   : > { %1859 = vmatprep.subr.bf16.mxu0 %v1314_v31  ;;  %v1103_v20 = vpop.permute.xlu1 %1102 }
 0x4d4   : > { %1860 = vmatpush3.bf16.msra.mxu0 %v1314_v31 }
 0x4d7   : > { %1862 = vmatmul.mubr.msk.bf16.vlgmr.msra.gmra.mrb[16].mxu0 %vm511_vm2, %v3067_v60  ;;  %v1113_v31 = vpop.permute.xlu1 %1112  ;;  %v1118_v60 = vpop.permute.xlu0 %1117 }
 0x4d8   : > { %1865 = vmatprep.mubr.msk.bf16.mxu0 %vm511_vm2, %v3068_v50 }
 0x4db   : > { %v2871_v50 = vpop.permute.xlu1 %1122 }
 0x4df   : > { %1866 = vmatmul.mubr.msk.bf16.gmra.mrb[20].mxu0 %vm511_vm2, %v3069_v11  ;;  %v2873_v11 = vpop.permute.xlu0 %1127 }
 0x51a   : > { %v1196_v57 = vpop.f32.mrb[24].mxu1 }
 0x51b   : > { %v1198_v34 = vpop.f32.mrb[25].mxu1 }
 0x51c   : > { %v1200_v43 = vpop.f32.mrb[26].mxu1 }
 0x51d   : > { %v1202_v56 = vpop.f32.mrb[27].mxu1 }
 0x522   : > { %v1206_v59 = vpop.f32.mrb[28].mxu1 }
 0x523   : > { %v1208_v38 = vpop.f32.mrb[29].mxu1 }
 0x524   : > { %v1210_v39 = vpop.f32.mrb[30].mxu1 }
 0x525   : > { %v1212_v25 = vpop.f32.mrb[31].mxu1 }
 0x52a   : > { %v2847_v42 = vpop.f32.mrb[32].mxu1 }
 0x52b   : > { %v2849_v44 = vpop.f32.mrb[33].mxu1 }
 0x52c   : > { %v2851_v15 = vpop.f32.mrb[34].mxu1 }
 0x52d   : > { %v2853_v22 = vpop.f32.mrb[35].mxu1 }
 0x532   : > { %v2855_v55 = vpop.f32.mrb[36].mxu1 }
 0x533   : > { %v2857_v41 = vpop.f32.mrb[37].mxu1 }
 0x534   : > { %v2859_v7 = vpop.f32.mrb[38].mxu1 }
 0x535   : > { %v2861_v49 = vpop.f32.mrb[39].mxu1 }
 0x5aa   : > { %v1863_v48 = vpop.f32.mrb[16].mxu0 }
 0x5ab   : > { %v1358_v40 = vadd.f32 %v1863_v48, %v3070_v28  ;;  %v1349_v24 = vpop.f32.mrb[17].mxu0  ;;  %v1207_v48 = vadd.f32 %v1206_v59, %v1103_v20  ;;  %v1209_v28 = vadd.f32 %v1208_v38, %v1103_v20  ;;  %v1223_v20 = vadd.f32 %v2853_v22, %v1118_v60 }
 0x5ac   : > { %v1864_v14 = vpop.f32.mrb[18].mxu0  ;;  %v1350_v36 = vadd.f32 %v3072_v29, %v1349_v24  ;;  %v1211_v24 = vadd.f32 %v1210_v39, %v1108_v37 }
 0x5ad   : > { %v1361_v35 = vadd.f32 %v1864_v14, %v3071_v54  ;;  %1392 = vperm.xlu1 %1923, %v1358_v40   ;;  %v1352_v12 = vpop.f32.mrb[19].mxu0  ;;  %v1213_v14 = vadd.f32 %v1212_v25, %v1108_v37 }
 0x5ae   : > { %v1353_v9 = vadd.f32 %v3073_v13, %v1352_v12  ;;  %v1197_v12 = vadd.f32 %v1196_v57, %v1093_v16 }
 0x5af   : > { %1397 = vperm.xlu0 %1922, %v1361_v35  }
 0x5b1   : > { %1382 = vperm.xlu1 %1923, %v1350_v36  }
 0x5b2   : > { %v1867_v30 = vpop.f32.mrb[20].mxu0 }
 0x5b3   : > { %v1365_v32 = vpop.f32.mrb[21].mxu0  ;;  %1387 = vperm.xlu0 %1922, %v1353_v9   ;;  %v1374_v17 = vadd.f32 %v1867_v30, %v3076_v46  ;;  %v1217_v46 = vadd.f32 %v2847_v42, %v1113_v31 }
 0x5b4   : > { %v1366_v58 = vadd.f32 %v3074_v52, %v1365_v32  ;;  %v1868_v27 = vpop.f32.mrb[22].mxu0  ;;  %v1199_v32 = vadd.f32 %v1198_v34, %v1093_v16  ;;  %v1201_v52 = vadd.f32 %v1200_v43, %v1098_v62 }
 0x5b5   : > { %v1368_v33 = vpop.f32.mrb[23].mxu0  ;;  %v1377_v19 = vadd.f32 %v1868_v27, %v3077_v47 }
 0x5b6   : > { %v1369_v0 = vadd.f32 %v3075_v8, %v1368_v33  ;;  %1402 = vperm.xlu1 %1923, %v1366_v58   ;;  %v1203_v58 = vadd.f32 %v1202_v56, %v1098_v62 }
 0x5b8   : > { %1407 = vperm.xlu0 %1922, %v1369_v0  }
 0x5ba   : > { %1412 = vperm.xlu1 %1923, %v1374_v17   ;;  %v1219_v17 = vadd.f32 %v2849_v44, %v1113_v31 }
 0x5bc   : > { %1417 = vperm.xlu0 %1922, %v1377_v19   ;;  %v1221_v19 = vadd.f32 %v2851_v15, %v1118_v60  ;;  %v1227_v15 = vadd.f32 %v2855_v55, %v2871_v50 }
 0x62c   : > { %v1393_v40 = vpop.permute.xlu1 %1392 }
 0x62d   : > { %v1424_v54 = vadd.f32 %v1393_v40, %v1207_v48  ;;  %v1425_v35 = vadd.f32 %v1393_v40, %v1209_v28 }
 0x62e   : > { %v1398_v29 = vpop.permute.xlu0 %1397 }
 0x62f   : > { %v1785_v36 = vmul.f32 -1.442695, %v1424_v54  ;;  %v1786_v13 = vmul.f32 -1.442695, %v1425_v35  ;;  %v1426_v9 = vadd.f32 %v1398_v29, %v1211_v24  ;;  %v1427_v30 = vadd.f32 %v1398_v29, %v1213_v14 }
 0x630   : > { %v1383_v27 = vpop.permute.xlu1 %1382 }
 0x631   : > { %2003 = vpow2.f32 %v1785_v36  ;;  %v1787_v33 = vmul.f32 -1.442695, %v1426_v9  ;;  %v1788_v8 = vmul.f32 -1.442695, %v1427_v30  ;;  %v1420_v59 = vadd.f32 %v1383_v27, %v1197_v12 }
 0x632   : > { %2005 = vpow2.f32 %v1786_v13  ;;  %v1421_v38 = vadd.f32 %v1383_v27, %v1199_v32  ;;  %v1388_v39 = vpop.permute.xlu0 %1387 }
 0x633   : > { %2007 = vpow2.f32 %v1787_v33  ;;  %v1781_v25 = vmul.f32 -1.442695, %v1420_v59  ;;  %v1422_v0 = vadd.f32 %v1388_v39, %v1201_v52  ;;  %v1423_v57 = vadd.f32 %v1388_v39, %v1203_v58 }
 0x634   : > { %2009 = vpow2.f32 %v1788_v8  ;;  %v1782_v34 = vmul.f32 -1.442695, %v1421_v38  ;;  %v1229_v58 = vadd.f32 %v2857_v41, %v2871_v50  ;;  %v1231_v8 = vadd.f32 %v2859_v7, %v2873_v11 }
 0x635   : > { %2011 = vpow2.f32 %v1781_v25  ;;  %v1783_v43 = vmul.f32 -1.442695, %v1422_v0  ;;  %v1784_v56 = vmul.f32 -1.442695, %v1423_v57  ;;  %v1403_v47 = vpop.permute.xlu1 %1402  ;;  %v1233_v39 = vadd.f32 %v2861_v49, %v2873_v11 }
 0x636   : > { %2013 = vpow2.f32 %v1782_v34  ;;  %v1428_v16 = vadd.f32 %v1403_v47, %v1217_v46  ;;  %v1429_v62 = vadd.f32 %v1403_v47, %v1219_v17 }
 0x637   : > { %2015 = vpow2.f32 %v1783_v43  ;;  %v1408_v37 = vpop.permute.xlu0 %1407 }
 0x638   : > { %2017 = vpow2.f32 %v1784_v56  ;;  %v1789_v48 = vmul.f32 -1.442695, %v1428_v16  ;;  %v1790_v42 = vmul.f32 -1.442695, %v1429_v62  ;;  %v1430_v28 = vadd.f32 %v1408_v37, %v1221_v19 }
 0x639   : > { %v1431_v44 = vadd.f32 %v1408_v37, %v1223_v20  ;;  %v1413_v14 = vpop.permute.xlu1 %1412 }
 0x63a   : > { %2019 = vpow2.f32 %v1789_v48  ;;  %v1791_v31 = vmul.f32 -1.442695, %v1430_v28  ;;  %v1432_v36 = vadd.f32 %v1413_v14, %v1227_v15  ;;  %v1433_v0 = vadd.f32 %v1413_v14, %v1229_v58  ;;  %v2067_v28 = vld [vmem:[%s2335_s13 + $0x20] sm:$0xff] }
 0x63b   : > { %v2004_v40 = vpop.eup %2003  ;;  %2021 = vpow2.f32 %v1790_v42  ;;  %v1792_v24 = vmul.f32 -1.442695, %v1431_v44  ;;  %v1418_v27 = vpop.permute.xlu0 %1417 }
 0x63c   : > { %v2006_v54 = vpop.eup %2005  ;;  %v1488_v35 = vadd.f32 1.0, %v2004_v40  ;;  %2023 = vpow2.f32 %v1791_v31  ;;  %v1793_v38 = vmul.f32 -1.442695, %v1432_v36  ;;  %v1434_v46 = vadd.f32 %v1418_v27, %v1231_v8 }
 0x63d   : > { %v2008_v22 = vpop.eup %2007  ;;  %v1489_v60 = vadd.f32 1.0, %v2006_v54  ;;  %2025 = vpow2.f32 %v1792_v24  ;;  %v1435_v17 = vadd.f32 %v1418_v27, %v1233_v39  ;;  %v1794_v47 = vmul.f32 -1.442695, %v1433_v0  ;;  %v2068_v24 = vld [vmem:[%s2335_s13 + $0x28] sm:$0xff]  ;;  %v2075_v39 = vld [vmem:[%s2335_s13 + $0x40] sm:$0xff] }
 0x63e   : > { %v2010_v12 = vpop.eup %2009  ;;  %2027 = vrcp.f32 %v1488_v35  ;;  %v1490_v29 = vadd.f32 1.0, %v2008_v22  ;;  %v1795_v11 = vmul.f32 -1.442695, %v1434_v46  ;;  %v2076_v46 = vld [vmem:[%s2335_s13 + $0x48] sm:$0xff] }
 0x63f   : > { %v2012_v13 = vpop.eup %2011  ;;  %2029 = vrcp.f32 %v1489_v60  ;;  %v1491_v9 = vadd.f32 1.0, %v2010_v12  ;;  %v1796_v20 = vmul.f32 -1.442695, %v1435_v17  ;;  %v2077_v17 = vld [vmem:[%s2335_s13 + $0x50] sm:$0xff] }
 0x640   : > { %v2014_v30 = vpop.eup %2013  ;;  %2031 = vrcp.f32 %v1490_v29  ;;  %v1484_v32 = vadd.f32 1.0, %v2012_v13  ;;  %v2071_v29 = vld [vmem:[%s2335_s13] sm:$0xff] }
 0x641   : > { %v2016_v52 = vpop.eup %2015  ;;  %2033 = vrcp.f32 %v1491_v9  ;;  %v1485_v55 = vadd.f32 1.0, %v2014_v30 }
 0x642   : > { %v2018_v33 = vpop.eup %2017  ;;  %2035 = vrcp.f32 %v1484_v32  ;;  %v1486_v59 = vadd.f32 1.0, %v2016_v52 }
 0x643   : > { %2037 = vrcp.f32 %v1485_v55  ;;  %v1487_v25 = vadd.f32 1.0, %v2018_v33  ;;  %v2074_v33 = vld [vmem:[%s2335_s13 + $0x18] sm:$0xff] }
 0x644   : > { %v2020_v57 = vpop.eup %2019  ;;  %2039 = vrcp.f32 %v1486_v59 }
 0x645   : > { %v2022_v41 = vpop.eup %2021  ;;  %2041 = vrcp.f32 %v1487_v25  ;;  %v1492_v50 = vadd.f32 1.0, %v2020_v57 }
 0x646   : > { %v2024_v34 = vpop.eup %2023  ;;  %v1493_v43 = vadd.f32 1.0, %v2022_v41  ;;  %2043 = vpow2.f32 %v1793_v38 }
 0x647   : > { %v2026_v7 = vpop.eup %2025  ;;  %2045 = vrcp.f32 %v1492_v50  ;;  %v1494_v56 = vadd.f32 1.0, %v2024_v34 }
 0x648   : > { %v2028_v19 = vpop.eup %2027  ;;  %2047 = vrcp.f32 %v1493_v43  ;;  %v1495_v49 = vadd.f32 1.0, %v2026_v7  ;;  %v2078_v7 = vld [vmem:[%s2335_s13 + $0x58] sm:$0xff] }
 0x649   : > { %v2030_v16 = vpop.eup %2029  ;;  %v1536_v62 = vmul.f32 %v2028_v19, %v2678_v45  ;;  %2049 = vrcp.f32 %v1494_v56 }
 0x64a   : > { %v2032_v37 = vpop.eup %2031  ;;  %v1537_v48 = vmul.f32 %v2030_v16, %v2682_v51  ;;  %2051 = vrcp.f32 %v1495_v49  ;;  %v2069_v51 = vld [vmem:[%s2335_s13 + $0x30] sm:$0xff]  ;;  %v2079_v49 = vld [vmem:[%s2335_s13 + $0x60] sm:$0xff] }
 0x64b   : > { %v2034_v42 = vpop.eup %2033  ;;  %v1552_v44 = vadd.f32 %v2067_v28, %v1536_v62  ;;  %v1538_v31 = vmul.f32 %v2032_v37, %v2686_v23  ;;  %2053 = vpow2.f32 %v1794_v47 }
 0x64c   : > { %v2036_v40 = vpop.eup %2035  ;;  %v1553_v14 = vadd.f32 %v2068_v24, %v1537_v48  ;;  %v1539_v45 = vmul.f32 %v2034_v42, %v2690_v1  ;;  %2055 = vpow2.f32 %v1795_v11  ;;  %v2070_v1 = vld [vmem:[%s2335_s13 + $0x38] sm:$0xff]  ;;  %v2080_v42 = vld [vmem:[%s2335_s13 + $0x68] sm:$0xff] }
 0x64d   : > { %v2038_v54 = vpop.eup %2037  ;;  %1568 = vst [vmem:[%s2895_s12 + $0x20] sm:$0xff] %v1552_v44  ;;  %v1554_v23 = vadd.f32 %v2069_v51, %v1538_v31  ;;  %v1532_v15 = vmul.f32 %v2036_v40, %v2694_v2  ;;  %2057 = vpow2.f32 %v1796_v20  ;;  %v2072_v2 = vld [vmem:[%s2335_s13 + $0x8] sm:$0xff]  ;;  %v2081_v44 = vld [vmem:[%s2335_s13 + $0x70] sm:$0xff] }
 0x64e   : > { %v2040_v35 = vpop.eup %2039  ;;  %1569 = vst [vmem:[%s2895_s12 + $0x28] sm:$0xff] %v1553_v14  ;;  %v1555_v22 = vadd.f32 %v2070_v1, %v1539_v45  ;;  %v1533_v60 = vmul.f32 %v2038_v54, %v2699_v18  ;;  %v2073_v18 = vld [vmem:[%s2335_s13 + $0x10] sm:$0xff] }
 0x64f   : > { %v2042_v12 = vpop.eup %2041  ;;  %1570 = vst [vmem:[%s2895_s12 + $0x30] sm:$0xff] %v1554_v23  ;;  %v1548_v36 = vadd.f32 %v2071_v29, %v1532_v15  ;;  %v1534_v13 = vmul.f32 %v2040_v35, %v2710_v6 }
 0x650   : > { %v2044_v9 = vpop.eup %2043  ;;  %1571 = vst [vmem:[%s2895_s12 + $0x38] sm:$0xff] %v1555_v22  ;;  %v1549_v30 = vadd.f32 %v2072_v2, %v1533_v60  ;;  %v1535_v32 = vmul.f32 %v2042_v12, %v2716_v3 }
 0x651   : > { %v2046_v52 = vpop.eup %2045  ;;  %1564 = vst [vmem:[%s2895_s12] sm:$0xff] %v1548_v36  ;;  %v1550_v58 = vadd.f32 %v2073_v18, %v1534_v13  ;;  %v1496_v55 = vadd.f32 1.0, %v2044_v9 }
 0x652   : > { %v2048_v27 = vpop.eup %2047  ;;  %1565 = vst [vmem:[%s2895_s12 + $0x8] sm:$0xff] %v1549_v30  ;;  %v1551_v8 = vadd.f32 %v2074_v33, %v1535_v32  ;;  %v1540_v6 = vmul.f32 %v2046_v52, %v2750_v63 }
 0x653   : > { %v2050_v59 = vpop.eup %2049  ;;  %1566 = vst [vmem:[%s2895_s12 + $0x10] sm:$0xff] %v1550_v58  ;;  %v1541_v3 = vmul.f32 %v2048_v27, %v2757_v53  ;;  %2059 = vrcp.f32 %v1496_v55 }
 0x654   : > { %v2052_v38 = vpop.eup %2051  ;;  %1567 = vst [vmem:[%s2895_s12 + $0x18] sm:$0xff] %v1551_v8  ;;  %v1556_v25 = vadd.f32 %v2075_v39, %v1540_v6  ;;  %v1542_v0 = vmul.f32 %v2050_v59, %v2725_v21 }
 0x655   : > { %v2054_v57 = vpop.eup %2053  ;;  %v1557_v41 = vadd.f32 %v2076_v46, %v1541_v3  ;;  %v1543_v63 = vmul.f32 %v2052_v38, %v2731_v26 }
 0x656   : > { %v2056_v50 = vpop.eup %2055  ;;  %1572 = vst [vmem:[%s2895_s12 + $0x40] sm:$0xff] %v1556_v25  ;;  %v1558_v53 = vadd.f32 %v2077_v17, %v1542_v0  ;;  %v1497_v34 = vadd.f32 1.0, %v2054_v57 }
 0x657   : > { %v2058_v43 = vpop.eup %2057  ;;  %1573 = vst [vmem:[%s2895_s12 + $0x48] sm:$0xff] %v1557_v41  ;;  %v1559_v56 = vadd.f32 %v2078_v7, %v1543_v63  ;;  %v1498_v47 = vadd.f32 1.0, %v2056_v50 }
 0x658   : > { %1574 = vst [vmem:[%s2895_s12 + $0x50] sm:$0xff] %v1558_v53  ;;  %2061 = vrcp.f32 %v1497_v34  ;;  %v1499_v21 = vadd.f32 1.0, %v2058_v43 }
 0x659   : > { %1575 = vst [vmem:[%s2895_s12 + $0x58] sm:$0xff] %v1559_v56  ;;  %2063 = vrcp.f32 %v1498_v47 }
 0x65a   : > { %2065 = vrcp.f32 %v1499_v21 }
 0x65d   : > { %v2060_v26 = vpop.eup %2059 }
 0x65e   : > { %v1544_v19 = vmul.f32 %v2060_v26, %v2763_v4 }
 0x660   : > { %v1560_v11 = vadd.f32 %v2079_v49, %v1544_v19 }
 0x662   : > { %v2062_v16 = vpop.eup %2061  ;;  %1576 = vst [vmem:[%s2895_s12 + $0x60] sm:$0xff] %v1560_v11 }
 0x663   : > { %v2064_v62 = vpop.eup %2063  ;;  %v1545_v20 = vmul.f32 %v2062_v16, %v2767_v5  ;;  %v2082_v5 = vld [vmem:[%s2335_s13 + $0x78] sm:$0xff] }
 0x664   : > { %v2066_v37 = vpop.eup %2065  ;;  %v1546_v48 = vmul.f32 %v2064_v62, %v2742_v10 }
 0x665   : > { %v1561_v4 = vadd.f32 %v2080_v42, %v1545_v20  ;;  %v1547_v28 = vmul.f32 %v2066_v37, %v2746_v61 }
 0x666   : > { %v1562_v31 = vadd.f32 %v2081_v44, %v1546_v48 }
 0x667   : > { %1577 = vst [vmem:[%s2895_s12 + $0x68] sm:$0xff] %v1561_v4  ;;  %v1563_v10 = vadd.f32 %v2082_v5, %v1547_v28 }
 0x668   : > { %1578 = vst [vmem:[%s2895_s12 + $0x70] sm:$0xff] %v1562_v31 }
 0x669   : > { %1579 = vst [vmem:[%s2895_s12 + $0x78] sm:$0xff] %v1563_v10 }
 0x66a   : > { %2126 = shalt.err (!%p2123_p4)
}
 0x66b   : > { %s2127_s13 = scalar_lea.hbm %s2940_s19, 2048  ;;  %s2131_s28 = scalar_lea.hbm %s2996_s6, 4096 }
 0x66c   : > { %p2128_p5 = scmp.ne.s32.totalorder %s2940_s19, %s2127_s13  ;;  %p2132_p1 = scmp.lt.u32.totalorder %s2940_s19, %s2996_s6 }
 0x66d   : > { %p2133_p3 = scmp.lt.u32.totalorder %s2131_s28, %s2127_s13  ;;  %p2135_p6 = scmp.lt.u32.totalorder %s2127_s13, %s2940_s19 }
 0x66e   : > { %p2129_p7 = pnand %p2128_p5, %p3078_p12 }
 0x66f   : > { %p2134_p11 = por %p2133_p3, %p2132_p1 }
 0x670   : > { %p2130_p9 = pneg %p2129_p7 }
 0x671   : > { %p2136_p13 = por %p2135_p6, %p2134_p11 }
 0x673   : > { %p2137_p8 = pnand %p2136_p13, %p2130_p9 }
 0x675   : > { %2140 = shalt.err (!%p2137_p8)
}
 0x676   : > { %s2188_s8 = smov 256   ;;  %s2189_s18 = smov 16  }
 0x677   : > { %1871 = dma.vmem_to_hbm [thread:$0]  (%p3078_p12), %s2942_s16, 2048, %s2940_s19, %s1581_s25, %s2188_s8, %s2188_s8, %s2189_s18  }
 0x678 PF: > { %s1609_s20 = sand.u32 1, %s2167_s21   ;;  %p3079_p10 = scmp.ne.s32.totalorder %s3030_s10, 0 }
 0x679   : > { %p3080_p0 = scmp.ge.s32.totalorder %s2179_s24, 2  ;;  %s1610_s11 = scalar_lea.sflag [#allocation4], %s1609_s20 }
 0x67b   : > { %p1878_p2 = pnand %p3080_p0, %p3079_p10 }
 0x67d   : > { %2162 = dma.done.wait (!%p1878_p2), %s1610_s11, 2048  }
 0x67e   : > { %2164 = vsyncadd (!%p1878_p2), %s1610_s11, 4294965248  ;;  %p19_p4 = scmp.ge.s32.totalorder %s2250_s27, 4   ;;  %s3081_s21 = smov %s2171_s22 }
 0x67f   : > { %s3082_s22 = smov %s2175_s23  ;;  %s3083_s23 = smov %s2262_s30 }
 0x680   : > { %s3084_s24 = smov %s2250_s27  ;;  %21 = sbr.rel (!%p19_p4) target bundleno = 5 (0x5), region = 100 }
 0x687   :  { %1615 = vsyncpa [#allocation3], 1 }
 0x688   :  { %1617 = vsyncpa [#allocation3 + $0x1], 1 }
 0x689   :  { %1618 = vsyncpa [#allocation4], 1 }
 0x68a   :  { %1620 = vsyncpa [#allocation4 + $0x1], 1 }

</bundles_post_ra>
